<compile_context>
chip_gen: v5e
topology: v5e:2x2
jax: 0.10.0
libtpu: 0.0.40
codegen_flags: <defaults>
</compile_context>

<pallas_src>
from functools import partial

import jax
import jax.numpy as jnp
from jax.experimental import pallas as pl
from jax.experimental.pallas import tpu as pltpu


def lstm_classifier_kernel(x_ref, wih_t_ref, whh_t_ref, b_ref,
                           wp_t_ref, bp_ref, out_ref, xproj_ref,
                           *, seq_len, batch_pad):
    H = whh_t_ref.shape[0]

    # Hoisted input projection for ALL timesteps in one MXU pass, staged in
    # VMEM scratch (not held live in vregs across the recurrence):
    #   x_proj = x_flat @ W_ih^T + (b_ih + b_hh)        -> (S*B_pad, 4H)
    xproj_ref[...] = (jnp.dot(x_ref[...], wih_t_ref[...],
                              preferred_element_type=jnp.float32)
                      + b_ref[...])

    h = jnp.zeros((batch_pad, H), jnp.float32)
    c = jnp.zeros((batch_pad, H), jnp.float32)

    # Recurrence fully unrolled (static, short seq); h/c stay in registers.
    # W_hh is read at the dot site each step (don't hold 256 KiB live).
    for t in range(seq_len):
        gates = (xproj_ref[pl.ds(t * batch_pad, batch_pad), :]
                 + jnp.dot(h, whh_t_ref[...],
                           preferred_element_type=jnp.float32))
        i_g = jax.nn.sigmoid(gates[:, 0 * H:1 * H])
        f_g = jax.nn.sigmoid(gates[:, 1 * H:2 * H])
        g_g = jnp.tanh(gates[:, 2 * H:3 * H])
        o_g = jax.nn.sigmoid(gates[:, 3 * H:4 * H])
        c = f_g * c + i_g * g_g
        h = o_g * jnp.tanh(c)

    # Classifier + softmax (runs once).  Exact reciprocal to hold 1e-5.
    logits = (jnp.dot(h, wp_t_ref[...], preferred_element_type=jnp.float32)
              + bp_ref[...])
    m = jnp.max(logits, axis=-1, keepdims=True)
    e = jnp.exp(logits - m)
    out_ref[...] = e * pl.reciprocal(jnp.sum(e, axis=-1, keepdims=True))


def lstm_classifier_forward(x, params):
    """x: (seq_len, batch, input_size) float32 -> (batch, classes) float32."""
    seq_len, batch, input_size = x.shape
    w_ih, w_hh, b_ih, b_hh, w_pred, b_pred = params
    hidden = w_hh.shape[1]
    classes = w_pred.shape[0]

    # Pad batch to a full 8-row sublane tile so every per-step slice of
    # x_proj lands on an 8-row boundary (aligned, unmasked loads).
    batch_pad = max(8, ((batch + 7) // 8) * 8)
    if batch_pad != batch:
        x = jnp.pad(x, ((0, 0), (0, batch_pad - batch), (0, 0)))

    # Glue (host-side, one-time): pre-transpose weights, combine biases, and
    # flatten x so the hoisted projection is a plain (S*B_pad, I) @ (I, 4H).
    x_flat = x.reshape(seq_len * batch_pad, input_size)   # (S*B_pad, I)
    wih_t = jnp.transpose(w_ih)                           # (I, 4H)
    whh_t = jnp.transpose(w_hh)                           # (H, 4H)
    b = (b_ih + b_hh).reshape(1, 4 * hidden)              # (1, 4H)
    wp_t = jnp.transpose(w_pred)                          # (H, C)
    bp = b_pred.reshape(1, classes)                       # (1, C)

    grid_spec = pltpu.PrefetchScalarGridSpec(
        num_scalar_prefetch=0,
        grid=(1,),
        in_specs=[
            pl.BlockSpec((seq_len * batch_pad, input_size), lambda i: (0, 0)),
            pl.BlockSpec((input_size, 4 * hidden), lambda i: (0, 0)),
            pl.BlockSpec((hidden, 4 * hidden), lambda i: (0, 0)),
            pl.BlockSpec((1, 4 * hidden), lambda i: (0, 0)),
            pl.BlockSpec((hidden, classes), lambda i: (0, 0)),
            pl.BlockSpec((1, classes), lambda i: (0, 0)),
        ],
        out_specs=pl.BlockSpec((batch_pad, classes), lambda i: (0, 0)),
        scratch_shapes=[
            pltpu.VMEM((seq_len * batch_pad, 4 * hidden), jnp.float32),
        ],
    )

    kernel = partial(lstm_classifier_kernel,
                     seq_len=seq_len, batch_pad=batch_pad)

    out_pad = pl.pallas_call(
        kernel,
        out_shape=jax.ShapeDtypeStruct((batch_pad, classes), jnp.float32),
        grid_spec=grid_spec,
        compiler_params=pltpu.CompilerParams(
            dimension_semantics=("arbitrary",)),
    )(x_flat, wih_t, whh_t, b, wp_t, bp)

    # Drop the padded batch rows.
    return out_pad[:batch]


def init_params(key, input_size, hidden_size, classes):
    """Deterministic init mirroring PyTorch shapes (uniform +-1/sqrt(H))."""
    ks = jax.random.split(key, 6)
    s = 1.0 / jnp.sqrt(hidden_size)
    w_ih = jax.random.uniform(ks[0], (4 * hidden_size, input_size),
                              jnp.float32, -s, s)
    w_hh = jax.random.uniform(ks[1], (4 * hidden_size, hidden_size),
                              jnp.float32, -s, s)
    b_ih = jax.random.uniform(ks[2], (4 * hidden_size,), jnp.float32, -s, s)
    b_hh = jax.random.uniform(ks[3], (4 * hidden_size,), jnp.float32, -s, s)
    w_pred = jax.random.uniform(ks[4], (classes, hidden_size),
                                jnp.float32, -s, s)
    b_pred = jax.random.uniform(ks[5], (classes,), jnp.float32, -s, s)
    return (w_ih, w_hh, b_ih, b_hh, w_pred, b_pred)


def reference_forward(x, params):
    """Pure-JAX reference of the PyTorch forward (gate order i,f,g,o)."""
    w_ih, w_hh, b_ih, b_hh, w_pred, b_pred = params
    hidden = w_hh.shape[1]
    batch = x.shape[1]
    h = jnp.zeros((batch, hidden), jnp.float32)
    c = jnp.zeros((batch, hidden), jnp.float32)

    def step(carry, x_t):
        h, c = carry
        gates = x_t @ w_ih.T + h @ w_hh.T + b_ih + b_hh
        i = jax.nn.sigmoid(gates[:, 0 * hidden:1 * hidden])
        f = jax.nn.sigmoid(gates[:, 1 * hidden:2 * hidden])
        g = jnp.tanh(gates[:, 2 * hidden:3 * hidden])
        o = jax.nn.sigmoid(gates[:, 3 * hidden:4 * hidden])
        c = f * c + i * g
        h = o * jnp.tanh(c)
        return (h, c), None

    (h, c), _ = jax.lax.scan(step, (h, c), x)
    logits = h @ w_pred.T + b_pred
    return jax.nn.softmax(logits, axis=-1)


if __name__ == "__main__":
    seq_len, batch, input_size = 8, 4, 28
    hidden_size, classes = 128, 10

    key = jax.random.PRNGKey(0)
    k_x, k_p = jax.random.split(key)
    x = jax.random.normal(k_x, (seq_len, batch, input_size), jnp.float32)
    params = init_params(k_p, input_size, hidden_size, classes)

    out = lstm_classifier_forward(x, params)
    out = jax.block_until_ready(out)

    ref = reference_forward(x, params)
    assert out.shape == (batch, classes)
    assert jnp.allclose(out, ref, atol=1e-5, rtol=1e-5)

    print("KERNEL_OK")
</pallas_src>

<mosaic_0001>
module attributes {stable_mosaic.version = 11 : i64} {
  func.func @lstm_classifier_kernel(%arg0: i32, %arg1: memref<64x28xf32, #tpu.memory_space<vmem>>, %arg2: memref<28x512xf32, #tpu.memory_space<vmem>>, %arg3: memref<128x512xf32, #tpu.memory_space<vmem>>, %arg4: memref<1x512xf32, #tpu.memory_space<vmem>>, %arg5: memref<128x10xf32, #tpu.memory_space<vmem>>, %arg6: memref<1x10xf32, #tpu.memory_space<vmem>>, %arg7: memref<8x10xf32, #tpu.memory_space<vmem>>, %arg8: memref<64x512xf32, #tpu.memory_space<vmem>>) attributes {dimension_semantics = [#tpu.dimension_semantics<arbitrary>], iteration_bounds = array<i64: 1>, scalar_prefetch = 0 : i64, scratch_operands = 1 : i64, tpu.core_type = #tpu.core_type<tc>, window_params = [{pipeline_mode = #tpu.pipeline_mode<synchronous>, transform_indices = @transform_0, window_bounds = array<i64: 64, 28>}, {pipeline_mode = #tpu.pipeline_mode<synchronous>, transform_indices = @transform_1, window_bounds = array<i64: 28, 512>}, {pipeline_mode = #tpu.pipeline_mode<synchronous>, transform_indices = @transform_2, window_bounds = array<i64: 128, 512>}, {pipeline_mode = #tpu.pipeline_mode<synchronous>, transform_indices = @transform_3, window_bounds = array<i64: 1, 512>}, {pipeline_mode = #tpu.pipeline_mode<synchronous>, transform_indices = @transform_4, window_bounds = array<i64: 128, 10>}, {pipeline_mode = #tpu.pipeline_mode<synchronous>, transform_indices = @transform_5, window_bounds = array<i64: 1, 10>}, {pipeline_mode = #tpu.pipeline_mode<synchronous>, transform_indices = @transform_6, window_bounds = array<i64: 8, 10>}]} {
    %c0 = arith.constant 0 : index
    %c0_0 = arith.constant 0 : index
    %0 = vector.load %arg1[%c0, %c0_0] : memref<64x28xf32, #tpu.memory_space<vmem>>, vector<64x28xf32>
    %c0_1 = arith.constant 0 : index
    %c0_2 = arith.constant 0 : index
    %1 = vector.load %arg2[%c0_1, %c0_2] : memref<28x512xf32, #tpu.memory_space<vmem>>, vector<28x512xf32>
    %cst = arith.constant dense<0.000000e+00> : vector<64x512xf32>
    %2 = tpu.matmul %0, %1, %cst {dimension_numbers = #tpu.dot_dimension_numbers<[1], [0], [0], [1], [0, 0, 1, 1], [], []>} : vector<64x28xf32>, vector<28x512xf32>, vector<64x512xf32> -> vector<64x512xf32>
    %c0_3 = arith.constant 0 : index
    %c0_4 = arith.constant 0 : index
    %3 = vector.load %arg4[%c0_3, %c0_4] : memref<1x512xf32, #tpu.memory_space<vmem>>, vector<1x512xf32>
    %4 = vector.broadcast %3 : vector<1x512xf32> to vector<64x512xf32>
    %5 = arith.addf %2, %4 : vector<64x512xf32>
    %c0_5 = arith.constant 0 : index
    %c0_6 = arith.constant 0 : index
    %6 = vector.load %arg8[%c0_5, %c0_6] : memref<64x512xf32, #tpu.memory_space<vmem>>, vector<64x512xf32>
    tpu.vector_store %arg8[%c0_5, %c0_6], %5 {strides = array<i32>} : memref<64x512xf32, #tpu.memory_space<vmem>>, vector<64x512xf32>,
    %cst_7 = arith.constant 0.000000e+00 : f32
    %7 = vector.broadcast %cst_7 : f32 to vector<8x128xf32>
    %cst_8 = arith.constant 0.000000e+00 : f32
    %8 = vector.broadcast %cst_8 : f32 to vector<8x128xf32>
    %c0_9 = arith.constant 0 : index
    %c0_10 = arith.constant 0 : index
    %9 = vector.load %arg8[%c0_9, %c0_10] : memref<64x512xf32, #tpu.memory_space<vmem>>, vector<8x512xf32>
    %c0_11 = arith.constant 0 : index
    %c0_12 = arith.constant 0 : index
    %10 = vector.load %arg3[%c0_11, %c0_12] : memref<128x512xf32, #tpu.memory_space<vmem>>, vector<128x512xf32>
    %cst_13 = arith.constant dense<0.000000e+00> : vector<8x512xf32>
    %11 = tpu.matmul %7, %10, %cst_13 {dimension_numbers = #tpu.dot_dimension_numbers<[1], [0], [0], [1], [0, 0, 1, 1], [], []>} : vector<8x128xf32>, vector<128x512xf32>, vector<8x512xf32> -> vector<8x512xf32>
    %12 = arith.addf %9, %11 : vector<8x512xf32>
    %13 = vector.extract_strided_slice %12 {offsets = [0, 0], sizes = [8, 128], strides = [1, 1]} : vector<8x512xf32> to vector<8x128xf32>
    %14 = arith.negf %13 : vector<8x128xf32>
    %15 = math.exp %14 : vector<8x128xf32>
    %cst_14 = arith.constant 1.000000e+00 : f32
    %16 = vector.broadcast %cst_14 : f32 to vector<8x128xf32>
    %17 = arith.addf %16, %15 : vector<8x128xf32>
    %18 = arith.divf %16, %17 : vector<8x128xf32>
    %19 = vector.extract_strided_slice %12 {offsets = [0, 128], sizes = [8, 128], strides = [1, 1]} : vector<8x512xf32> to vector<8x128xf32>
    %20 = arith.negf %19 : vector<8x128xf32>
    %21 = math.exp %20 : vector<8x128xf32>
    %cst_15 = arith.constant 1.000000e+00 : f32
    %22 = vector.broadcast %cst_15 : f32 to vector<8x128xf32>
    %23 = arith.addf %22, %21 : vector<8x128xf32>
    %24 = arith.divf %22, %23 : vector<8x128xf32>
    %25 = vector.extract_strided_slice %12 {offsets = [0, 256], sizes = [8, 128], strides = [1, 1]} : vector<8x512xf32> to vector<8x128xf32>
    %26 = math.tanh %25 : vector<8x128xf32>
    %27 = vector.extract_strided_slice %12 {offsets = [0, 384], sizes = [8, 128], strides = [1, 1]} : vector<8x512xf32> to vector<8x128xf32>
    %28 = arith.negf %27 : vector<8x128xf32>
    %29 = math.exp %28 : vector<8x128xf32>
    %cst_16 = arith.constant 1.000000e+00 : f32
    %30 = vector.broadcast %cst_16 : f32 to vector<8x128xf32>
    %31 = arith.addf %30, %29 : vector<8x128xf32>
    %32 = arith.divf %30, %31 : vector<8x128xf32>
    %33 = arith.mulf %24, %8 : vector<8x128xf32>
    %34 = arith.mulf %18, %26 : vector<8x128xf32>
    %35 = arith.addf %33, %34 : vector<8x128xf32>
    %36 = math.tanh %35 : vector<8x128xf32>
    %37 = arith.mulf %32, %36 : vector<8x128xf32>
    %c8 = arith.constant 8 : index
    %c0_17 = arith.constant 0 : index
    %38 = vector.load %arg8[%c8, %c0_17] : memref<64x512xf32, #tpu.memory_space<vmem>>, vector<8x512xf32>
    %c0_18 = arith.constant 0 : index
    %c0_19 = arith.constant 0 : index
    %39 = vector.load %arg3[%c0_18, %c0_19] : memref<128x512xf32, #tpu.memory_space<vmem>>, vector<128x512xf32>
    %cst_20 = arith.constant dense<0.000000e+00> : vector<8x512xf32>
    %40 = tpu.matmul %37, %39, %cst_20 {dimension_numbers = #tpu.dot_dimension_numbers<[1], [0], [0], [1], [0, 0, 1, 1], [], []>} : vector<8x128xf32>, vector<128x512xf32>, vector<8x512xf32> -> vector<8x512xf32>
    %41 = arith.addf %38, %40 : vector<8x512xf32>
    %42 = vector.extract_strided_slice %41 {offsets = [0, 0], sizes = [8, 128], strides = [1, 1]} : vector<8x512xf32> to vector<8x128xf32>
    %43 = arith.negf %42 : vector<8x128xf32>
    %44 = math.exp %43 : vector<8x128xf32>
    %cst_21 = arith.constant 1.000000e+00 : f32
    %45 = vector.broadcast %cst_21 : f32 to vector<8x128xf32>
    %46 = arith.addf %45, %44 : vector<8x128xf32>
    %47 = arith.divf %45, %46 : vector<8x128xf32>
    %48 = vector.extract_strided_slice %41 {offsets = [0, 128], sizes = [8, 128], strides = [1, 1]} : vector<8x512xf32> to vector<8x128xf32>
    %49 = arith.negf %48 : vector<8x128xf32>
    %50 = math.exp %49 : vector<8x128xf32>
    %cst_22 = arith.constant 1.000000e+00 : f32
    %51 = vector.broadcast %cst_22 : f32 to vector<8x128xf32>
    %52 = arith.addf %51, %50 : vector<8x128xf32>
    %53 = arith.divf %51, %52 : vector<8x128xf32>
    %54 = vector.extract_strided_slice %41 {offsets = [0, 256], sizes = [8, 128], strides = [1, 1]} : vector<8x512xf32> to vector<8x128xf32>
    %55 = math.tanh %54 : vector<8x128xf32>
    %56 = vector.extract_strided_slice %41 {offsets = [0, 384], sizes = [8, 128], strides = [1, 1]} : vector<8x512xf32> to vector<8x128xf32>
    %57 = arith.negf %56 : vector<8x128xf32>
    %58 = math.exp %57 : vector<8x128xf32>
    %cst_23 = arith.constant 1.000000e+00 : f32
    %59 = vector.broadcast %cst_23 : f32 to vector<8x128xf32>
    %60 = arith.addf %59, %58 : vector<8x128xf32>
    %61 = arith.divf %59, %60 : vector<8x128xf32>
    %62 = arith.mulf %53, %35 : vector<8x128xf32>
    %63 = arith.mulf %47, %55 : vector<8x128xf32>
    %64 = arith.addf %62, %63 : vector<8x128xf32>
    %65 = math.tanh %64 : vector<8x128xf32>
    %66 = arith.mulf %61, %65 : vector<8x128xf32>
    %c16 = arith.constant 16 : index
    %c0_24 = arith.constant 0 : index
    %67 = vector.load %arg8[%c16, %c0_24] : memref<64x512xf32, #tpu.memory_space<vmem>>, vector<8x512xf32>
    %c0_25 = arith.constant 0 : index
    %c0_26 = arith.constant 0 : index
    %68 = vector.load %arg3[%c0_25, %c0_26] : memref<128x512xf32, #tpu.memory_space<vmem>>, vector<128x512xf32>
    %cst_27 = arith.constant dense<0.000000e+00> : vector<8x512xf32>
    %69 = tpu.matmul %66, %68, %cst_27 {dimension_numbers = #tpu.dot_dimension_numbers<[1], [0], [0], [1], [0, 0, 1, 1], [], []>} : vector<8x128xf32>, vector<128x512xf32>, vector<8x512xf32> -> vector<8x512xf32>
    %70 = arith.addf %67, %69 : vector<8x512xf32>
    %71 = vector.extract_strided_slice %70 {offsets = [0, 0], sizes = [8, 128], strides = [1, 1]} : vector<8x512xf32> to vector<8x128xf32>
    %72 = arith.negf %71 : vector<8x128xf32>
    %73 = math.exp %72 : vector<8x128xf32>
    %cst_28 = arith.constant 1.000000e+00 : f32
    %74 = vector.broadcast %cst_28 : f32 to vector<8x128xf32>
    %75 = arith.addf %74, %73 : vector<8x128xf32>
    %76 = arith.divf %74, %75 : vector<8x128xf32>
    %77 = vector.extract_strided_slice %70 {offsets = [0, 128], sizes = [8, 128], strides = [1, 1]} : vector<8x512xf32> to vector<8x128xf32>
    %78 = arith.negf %77 : vector<8x128xf32>
    %79 = math.exp %78 : vector<8x128xf32>
    %cst_29 = arith.constant 1.000000e+00 : f32
    %80 = vector.broadcast %cst_29 : f32 to vector<8x128xf32>
    %81 = arith.addf %80, %79 : vector<8x128xf32>
    %82 = arith.divf %80, %81 : vector<8x128xf32>
    %83 = vector.extract_strided_slice %70 {offsets = [0, 256], sizes = [8, 128], strides = [1, 1]} : vector<8x512xf32> to vector<8x128xf32>
    %84 = math.tanh %83 : vector<8x128xf32>
    %85 = vector.extract_strided_slice %70 {offsets = [0, 384], sizes = [8, 128], strides = [1, 1]} : vector<8x512xf32> to vector<8x128xf32>
    %86 = arith.negf %85 : vector<8x128xf32>
    %87 = math.exp %86 : vector<8x128xf32>
    %cst_30 = arith.constant 1.000000e+00 : f32
    %88 = vector.broadcast %cst_30 : f32 to vector<8x128xf32>
    %89 = arith.addf %88, %87 : vector<8x128xf32>
    %90 = arith.divf %88, %89 : vector<8x128xf32>
    %91 = arith.mulf %82, %64 : vector<8x128xf32>
    %92 = arith.mulf %76, %84 : vector<8x128xf32>
    %93 = arith.addf %91, %92 : vector<8x128xf32>
    %94 = math.tanh %93 : vector<8x128xf32>
    %95 = arith.mulf %90, %94 : vector<8x128xf32>
    %c24 = arith.constant 24 : index
    %c0_31 = arith.constant 0 : index
    %96 = vector.load %arg8[%c24, %c0_31] : memref<64x512xf32, #tpu.memory_space<vmem>>, vector<8x512xf32>
    %c0_32 = arith.constant 0 : index
    %c0_33 = arith.constant 0 : index
    %97 = vector.load %arg3[%c0_32, %c0_33] : memref<128x512xf32, #tpu.memory_space<vmem>>, vector<128x512xf32>
    %cst_34 = arith.constant dense<0.000000e+00> : vector<8x512xf32>
    %98 = tpu.matmul %95, %97, %cst_34 {dimension_numbers = #tpu.dot_dimension_numbers<[1], [0], [0], [1], [0, 0, 1, 1], [], []>} : vector<8x128xf32>, vector<128x512xf32>, vector<8x512xf32> -> vector<8x512xf32>
    %99 = arith.addf %96, %98 : vector<8x512xf32>
    %100 = vector.extract_strided_slice %99 {offsets = [0, 0], sizes = [8, 128], strides = [1, 1]} : vector<8x512xf32> to vector<8x128xf32>
    %101 = arith.negf %100 : vector<8x128xf32>
    %102 = math.exp %101 : vector<8x128xf32>
    %cst_35 = arith.constant 1.000000e+00 : f32
    %103 = vector.broadcast %cst_35 : f32 to vector<8x128xf32>
    %104 = arith.addf %103, %102 : vector<8x128xf32>
    %105 = arith.divf %103, %104 : vector<8x128xf32>
    %106 = vector.extract_strided_slice %99 {offsets = [0, 128], sizes = [8, 128], strides = [1, 1]} : vector<8x512xf32> to vector<8x128xf32>
    %107 = arith.negf %106 : vector<8x128xf32>
    %108 = math.exp %107 : vector<8x128xf32>
    %cst_36 = arith.constant 1.000000e+00 : f32
    %109 = vector.broadcast %cst_36 : f32 to vector<8x128xf32>
    %110 = arith.addf %109, %108 : vector<8x128xf32>
    %111 = arith.divf %109, %110 : vector<8x128xf32>
    %112 = vector.extract_strided_slice %99 {offsets = [0, 256], sizes = [8, 128], strides = [1, 1]} : vector<8x512xf32> to vector<8x128xf32>
    %113 = math.tanh %112 : vector<8x128xf32>
    %114 = vector.extract_strided_slice %99 {offsets = [0, 384], sizes = [8, 128], strides = [1, 1]} : vector<8x512xf32> to vector<8x128xf32>
    %115 = arith.negf %114 : vector<8x128xf32>
    %116 = math.exp %115 : vector<8x128xf32>
    %cst_37 = arith.constant 1.000000e+00 : f32
    %117 = vector.broadcast %cst_37 : f32 to vector<8x128xf32>
    %118 = arith.addf %117, %116 : vector<8x128xf32>
    %119 = arith.divf %117, %118 : vector<8x128xf32>
    %120 = arith.mulf %111, %93 : vector<8x128xf32>
    %121 = arith.mulf %105, %113 : vector<8x128xf32>
    %122 = arith.addf %120, %121 : vector<8x128xf32>
    %123 = math.tanh %122 : vector<8x128xf32>
    %124 = arith.mulf %119, %123 : vector<8x128xf32>
    %c32 = arith.constant 32 : index
    %c0_38 = arith.constant 0 : index
    %125 = vector.load %arg8[%c32, %c0_38] : memref<64x512xf32, #tpu.memory_space<vmem>>, vector<8x512xf32>
    %c0_39 = arith.constant 0 : index
    %c0_40 = arith.constant 0 : index
    %126 = vector.load %arg3[%c0_39, %c0_40] : memref<128x512xf32, #tpu.memory_space<vmem>>, vector<128x512xf32>
    %cst_41 = arith.constant dense<0.000000e+00> : vector<8x512xf32>
    %127 = tpu.matmul %124, %126, %cst_41 {dimension_numbers = #tpu.dot_dimension_numbers<[1], [0], [0], [1], [0, 0, 1, 1], [], []>} : vector<8x128xf32>, vector<128x512xf32>, vector<8x512xf32> -> vector<8x512xf32>
    %128 = arith.addf %125, %127 : vector<8x512xf32>
    %129 = vector.extract_strided_slice %128 {offsets = [0, 0], sizes = [8, 128], strides = [1, 1]} : vector<8x512xf32> to vector<8x128xf32>
    %130 = arith.negf %129 : vector<8x128xf32>
    %131 = math.exp %130 : vector<8x128xf32>
    %cst_42 = arith.constant 1.000000e+00 : f32
    %132 = vector.broadcast %cst_42 : f32 to vector<8x128xf32>
    %133 = arith.addf %132, %131 : vector<8x128xf32>
    %134 = arith.divf %132, %133 : vector<8x128xf32>
    %135 = vector.extract_strided_slice %128 {offsets = [0, 128], sizes = [8, 128], strides = [1, 1]} : vector<8x512xf32> to vector<8x128xf32>
    %136 = arith.negf %135 : vector<8x128xf32>
    %137 = math.exp %136 : vector<8x128xf32>
    %cst_43 = arith.constant 1.000000e+00 : f32
    %138 = vector.broadcast %cst_43 : f32 to vector<8x128xf32>
    %139 = arith.addf %138, %137 : vector<8x128xf32>
    %140 = arith.divf %138, %139 : vector<8x128xf32>
    %141 = vector.extract_strided_slice %128 {offsets = [0, 256], sizes = [8, 128], strides = [1, 1]} : vector<8x512xf32> to vector<8x128xf32>
    %142 = math.tanh %141 : vector<8x128xf32>
    %143 = vector.extract_strided_slice %128 {offsets = [0, 384], sizes = [8, 128], strides = [1, 1]} : vector<8x512xf32> to vector<8x128xf32>
    %144 = arith.negf %143 : vector<8x128xf32>
    %145 = math.exp %144 : vector<8x128xf32>
    %cst_44 = arith.constant 1.000000e+00 : f32
    %146 = vector.broadcast %cst_44 : f32 to vector<8x128xf32>
    %147 = arith.addf %146, %145 : vector<8x128xf32>
    %148 = arith.divf %146, %147 : vector<8x128xf32>
    %149 = arith.mulf %140, %122 : vector<8x128xf32>
    %150 = arith.mulf %134, %142 : vector<8x128xf32>
    %151 = arith.addf %149, %150 : vector<8x128xf32>
    %152 = math.tanh %151 : vector<8x128xf32>
    %153 = arith.mulf %148, %152 : vector<8x128xf32>
    %c40 = arith.constant 40 : index
    %c0_45 = arith.constant 0 : index
    %154 = vector.load %arg8[%c40, %c0_45] : memref<64x512xf32, #tpu.memory_space<vmem>>, vector<8x512xf32>
    %c0_46 = arith.constant 0 : index
    %c0_47 = arith.constant 0 : index
    %155 = vector.load %arg3[%c0_46, %c0_47] : memref<128x512xf32, #tpu.memory_space<vmem>>, vector<128x512xf32>
    %cst_48 = arith.constant dense<0.000000e+00> : vector<8x512xf32>
    %156 = tpu.matmul %153, %155, %cst_48 {dimension_numbers = #tpu.dot_dimension_numbers<[1], [0], [0], [1], [0, 0, 1, 1], [], []>} : vector<8x128xf32>, vector<128x512xf32>, vector<8x512xf32> -> vector<8x512xf32>
    %157 = arith.addf %154, %156 : vector<8x512xf32>
    %158 = vector.extract_strided_slice %157 {offsets = [0, 0], sizes = [8, 128], strides = [1, 1]} : vector<8x512xf32> to vector<8x128xf32>
    %159 = arith.negf %158 : vector<8x128xf32>
    %160 = math.exp %159 : vector<8x128xf32>
    %cst_49 = arith.constant 1.000000e+00 : f32
    %161 = vector.broadcast %cst_49 : f32 to vector<8x128xf32>
    %162 = arith.addf %161, %160 : vector<8x128xf32>
    %163 = arith.divf %161, %162 : vector<8x128xf32>
    %164 = vector.extract_strided_slice %157 {offsets = [0, 128], sizes = [8, 128], strides = [1, 1]} : vector<8x512xf32> to vector<8x128xf32>
    %165 = arith.negf %164 : vector<8x128xf32>
    %166 = math.exp %165 : vector<8x128xf32>
    %cst_50 = arith.constant 1.000000e+00 : f32
    %167 = vector.broadcast %cst_50 : f32 to vector<8x128xf32>
    %168 = arith.addf %167, %166 : vector<8x128xf32>
    %169 = arith.divf %167, %168 : vector<8x128xf32>
    %170 = vector.extract_strided_slice %157 {offsets = [0, 256], sizes = [8, 128], strides = [1, 1]} : vector<8x512xf32> to vector<8x128xf32>
    %171 = math.tanh %170 : vector<8x128xf32>
    %172 = vector.extract_strided_slice %157 {offsets = [0, 384], sizes = [8, 128], strides = [1, 1]} : vector<8x512xf32> to vector<8x128xf32>
    %173 = arith.negf %172 : vector<8x128xf32>
    %174 = math.exp %173 : vector<8x128xf32>
    %cst_51 = arith.constant 1.000000e+00 : f32
    %175 = vector.broadcast %cst_51 : f32 to vector<8x128xf32>
    %176 = arith.addf %175, %174 : vector<8x128xf32>
    %177 = arith.divf %175, %176 : vector<8x128xf32>
    %178 = arith.mulf %169, %151 : vector<8x128xf32>
    %179 = arith.mulf %163, %171 : vector<8x128xf32>
    %180 = arith.addf %178, %179 : vector<8x128xf32>
    %181 = math.tanh %180 : vector<8x128xf32>
    %182 = arith.mulf %177, %181 : vector<8x128xf32>
    %c48 = arith.constant 48 : index
    %c0_52 = arith.constant 0 : index
    %183 = vector.load %arg8[%c48, %c0_52] : memref<64x512xf32, #tpu.memory_space<vmem>>, vector<8x512xf32>
    %c0_53 = arith.constant 0 : index
    %c0_54 = arith.constant 0 : index
    %184 = vector.load %arg3[%c0_53, %c0_54] : memref<128x512xf32, #tpu.memory_space<vmem>>, vector<128x512xf32>
    %cst_55 = arith.constant dense<0.000000e+00> : vector<8x512xf32>
    %185 = tpu.matmul %182, %184, %cst_55 {dimension_numbers = #tpu.dot_dimension_numbers<[1], [0], [0], [1], [0, 0, 1, 1], [], []>} : vector<8x128xf32>, vector<128x512xf32>, vector<8x512xf32> -> vector<8x512xf32>
    %186 = arith.addf %183, %185 : vector<8x512xf32>
    %187 = vector.extract_strided_slice %186 {offsets = [0, 0], sizes = [8, 128], strides = [1, 1]} : vector<8x512xf32> to vector<8x128xf32>
    %188 = arith.negf %187 : vector<8x128xf32>
    %189 = math.exp %188 : vector<8x128xf32>
    %cst_56 = arith.constant 1.000000e+00 : f32
    %190 = vector.broadcast %cst_56 : f32 to vector<8x128xf32>
    %191 = arith.addf %190, %189 : vector<8x128xf32>
    %192 = arith.divf %190, %191 : vector<8x128xf32>
    %193 = vector.extract_strided_slice %186 {offsets = [0, 128], sizes = [8, 128], strides = [1, 1]} : vector<8x512xf32> to vector<8x128xf32>
    %194 = arith.negf %193 : vector<8x128xf32>
    %195 = math.exp %194 : vector<8x128xf32>
    %cst_57 = arith.constant 1.000000e+00 : f32
    %196 = vector.broadcast %cst_57 : f32 to vector<8x128xf32>
    %197 = arith.addf %196, %195 : vector<8x128xf32>
    %198 = arith.divf %196, %197 : vector<8x128xf32>
    %199 = vector.extract_strided_slice %186 {offsets = [0, 256], sizes = [8, 128], strides = [1, 1]} : vector<8x512xf32> to vector<8x128xf32>
    %200 = math.tanh %199 : vector<8x128xf32>
    %201 = vector.extract_strided_slice %186 {offsets = [0, 384], sizes = [8, 128], strides = [1, 1]} : vector<8x512xf32> to vector<8x128xf32>
    %202 = arith.negf %201 : vector<8x128xf32>
    %203 = math.exp %202 : vector<8x128xf32>
    %cst_58 = arith.constant 1.000000e+00 : f32
    %204 = vector.broadcast %cst_58 : f32 to vector<8x128xf32>
    %205 = arith.addf %204, %203 : vector<8x128xf32>
    %206 = arith.divf %204, %205 : vector<8x128xf32>
    %207 = arith.mulf %198, %180 : vector<8x128xf32>
    %208 = arith.mulf %192, %200 : vector<8x128xf32>
    %209 = arith.addf %207, %208 : vector<8x128xf32>
    %210 = math.tanh %209 : vector<8x128xf32>
    %211 = arith.mulf %206, %210 : vector<8x128xf32>
    %c56 = arith.constant 56 : index
    %c0_59 = arith.constant 0 : index
    %212 = vector.load %arg8[%c56, %c0_59] : memref<64x512xf32, #tpu.memory_space<vmem>>, vector<8x512xf32>
    %c0_60 = arith.constant 0 : index
    %c0_61 = arith.constant 0 : index
    %213 = vector.load %arg3[%c0_60, %c0_61] : memref<128x512xf32, #tpu.memory_space<vmem>>, vector<128x512xf32>
    %cst_62 = arith.constant dense<0.000000e+00> : vector<8x512xf32>
    %214 = tpu.matmul %211, %213, %cst_62 {dimension_numbers = #tpu.dot_dimension_numbers<[1], [0], [0], [1], [0, 0, 1, 1], [], []>} : vector<8x128xf32>, vector<128x512xf32>, vector<8x512xf32> -> vector<8x512xf32>
    %215 = arith.addf %212, %214 : vector<8x512xf32>
    %216 = vector.extract_strided_slice %215 {offsets = [0, 0], sizes = [8, 128], strides = [1, 1]} : vector<8x512xf32> to vector<8x128xf32>
    %217 = arith.negf %216 : vector<8x128xf32>
    %218 = math.exp %217 : vector<8x128xf32>
    %cst_63 = arith.constant 1.000000e+00 : f32
    %219 = vector.broadcast %cst_63 : f32 to vector<8x128xf32>
    %220 = arith.addf %219, %218 : vector<8x128xf32>
    %221 = arith.divf %219, %220 : vector<8x128xf32>
    %222 = vector.extract_strided_slice %215 {offsets = [0, 128], sizes = [8, 128], strides = [1, 1]} : vector<8x512xf32> to vector<8x128xf32>
    %223 = arith.negf %222 : vector<8x128xf32>
    %224 = math.exp %223 : vector<8x128xf32>
    %cst_64 = arith.constant 1.000000e+00 : f32
    %225 = vector.broadcast %cst_64 : f32 to vector<8x128xf32>
    %226 = arith.addf %225, %224 : vector<8x128xf32>
    %227 = arith.divf %225, %226 : vector<8x128xf32>
    %228 = vector.extract_strided_slice %215 {offsets = [0, 256], sizes = [8, 128], strides = [1, 1]} : vector<8x512xf32> to vector<8x128xf32>
    %229 = math.tanh %228 : vector<8x128xf32>
    %230 = vector.extract_strided_slice %215 {offsets = [0, 384], sizes = [8, 128], strides = [1, 1]} : vector<8x512xf32> to vector<8x128xf32>
    %231 = arith.negf %230 : vector<8x128xf32>
    %232 = math.exp %231 : vector<8x128xf32>
    %cst_65 = arith.constant 1.000000e+00 : f32
    %233 = vector.broadcast %cst_65 : f32 to vector<8x128xf32>
    %234 = arith.addf %233, %232 : vector<8x128xf32>
    %235 = arith.divf %233, %234 : vector<8x128xf32>
    %236 = arith.mulf %227, %209 : vector<8x128xf32>
    %237 = arith.mulf %221, %229 : vector<8x128xf32>
    %238 = arith.addf %236, %237 : vector<8x128xf32>
    %239 = math.tanh %238 : vector<8x128xf32>
    %240 = arith.mulf %235, %239 : vector<8x128xf32>
    %c0_66 = arith.constant 0 : index
    %c0_67 = arith.constant 0 : index
    %241 = vector.load %arg5[%c0_66, %c0_67] : memref<128x10xf32, #tpu.memory_space<vmem>>, vector<128x10xf32>
    %cst_68 = arith.constant dense<0.000000e+00> : vector<8x10xf32>
    %242 = tpu.matmul %240, %241, %cst_68 {dimension_numbers = #tpu.dot_dimension_numbers<[1], [0], [0], [1], [0, 0, 1, 1], [], []>} : vector<8x128xf32>, vector<128x10xf32>, vector<8x10xf32> -> vector<8x10xf32>
    %c0_69 = arith.constant 0 : index
    %c0_70 = arith.constant 0 : index
    %243 = vector.load %arg6[%c0_69, %c0_70] : memref<1x10xf32, #tpu.memory_space<vmem>>, vector<1x10xf32>
    %244 = vector.broadcast %243 : vector<1x10xf32> to vector<8x10xf32>
    %245 = arith.addf %242, %244 : vector<8x10xf32>
    %cst_71 = arith.constant dense<0xFF800000> : vector<8xf32>
    %246 = vector.multi_reduction <maximumf>, %245, %cst_71 [1] : vector<8x10xf32> to vector<8xf32>
    %247 = vector.shape_cast %246 : vector<8xf32> to vector<8x1xf32>
    %248 = vector.broadcast %247 : vector<8x1xf32> to vector<8x10xf32>
    %249 = arith.subf %245, %248 : vector<8x10xf32>
    %250 = math.exp %249 : vector<8x10xf32>
    %cst_72 = arith.constant dense<0.000000e+00> : vector<8xf32>
    %251 = vector.multi_reduction <add>, %250, %cst_72 [1] : vector<8x10xf32> to vector<8xf32>
    %252 = vector.shape_cast %251 : vector<8xf32> to vector<8x1xf32>
    %253 = tpu.reciprocal %252 : vector<8x1xf32> -> vector<8x1xf32>
    %254 = vector.broadcast %253 : vector<8x1xf32> to vector<8x10xf32>
    %255 = arith.mulf %250, %254 : vector<8x10xf32>
    %c0_73 = arith.constant 0 : index
    %c0_74 = arith.constant 0 : index
    %256 = vector.load %arg7[%c0_73, %c0_74] : memref<8x10xf32, #tpu.memory_space<vmem>>, vector<8x10xf32>
    tpu.vector_store %arg7[%c0_73, %c0_74], %255 {strides = array<i32>} : memref<8x10xf32, #tpu.memory_space<vmem>>, vector<8x10xf32>,
    return
  }
  func.func @transform_0(%arg0: i32) -> (i32, i32) {
    %c0_i32 = arith.constant 0 : i32
    %c0_i32_0 = arith.constant 0 : i32
    %c0_i32_1 = arith.constant 0 : i32
    return %c0_i32, %c0_i32_0 : i32, i32
  }
  func.func @transform_1(%arg0: i32) -> (i32, i32) {
    %c0_i32 = arith.constant 0 : i32
    %c0_i32_0 = arith.constant 0 : i32
    %c0_i32_1 = arith.constant 0 : i32
    return %c0_i32, %c0_i32_0 : i32, i32
  }
  func.func @transform_2(%arg0: i32) -> (i32, i32) {
    %c0_i32 = arith.constant 0 : i32
    %c0_i32_0 = arith.constant 0 : i32
    %c0_i32_1 = arith.constant 0 : i32
    return %c0_i32, %c0_i32_0 : i32, i32
  }
  func.func @transform_3(%arg0: i32) -> (i32, i32) {
    %c0_i32 = arith.constant 0 : i32
    %c0_i32_0 = arith.constant 0 : i32
    %c0_i32_1 = arith.constant 0 : i32
    return %c0_i32, %c0_i32_0 : i32, i32
  }
  func.func @transform_4(%arg0: i32) -> (i32, i32) {
    %c0_i32 = arith.constant 0 : i32
    %c0_i32_0 = arith.constant 0 : i32
    %c0_i32_1 = arith.constant 0 : i32
    return %c0_i32, %c0_i32_0 : i32, i32
  }
  func.func @transform_5(%arg0: i32) -> (i32, i32) {
    %c0_i32 = arith.constant 0 : i32
    %c0_i32_0 = arith.constant 0 : i32
    %c0_i32_1 = arith.constant 0 : i32
    return %c0_i32, %c0_i32_0 : i32, i32
  }
  func.func @transform_6(%arg0: i32) -> (i32, i32) {
    %c0_i32 = arith.constant 0 : i32
    %c0_i32_0 = arith.constant 0 : i32
    %c0_i32_1 = arith.constant 0 : i32
    return %c0_i32, %c0_i32_0 : i32, i32
  }
}

</mosaic_0001>

<bundles_post_ra>
// kernel: tpu_custom_call.1
= control target key start
LH: loop header
LB: loop body
LE: loop exit
PB: predicated region body
PF: predicated region fallthrough
CT: control target
= control target key end

     0   :  { %11 = vsyncpa [#allocation4], 0  ;;  %s3121_s0 = inlined_call_operand.vmem [shape: f32[64,28], index: 0, kind: input, shape index: {}]   ;;  %s3122_s1 = inlined_call_operand.vmem [shape: f32[28,512], index: 1, kind: input, shape index: {}]   ;;  %s3123_s2 = inlined_call_operand.hbm [shape: f32[128,512], index: 2, kind: input, shape index: {}]   ;;  %s3124_s3 = inlined_call_operand.vmem [shape: f32[1,512], index: 3, kind: input, shape index: {}]   ;;  %s3125_s4 = inlined_call_operand.vmem [shape: f32[128,10], index: 4, kind: input, shape index: {}]   ;;  %s3126_s5 = inlined_call_operand.vmem [shape: f32[1,10], index: 5, kind: input, shape index: {}]   ;;  %s3127_s6 = inlined_call_operand.hbm [shape: f32[8,10], index: 6, kind: output, shape index: {}]  }
   0x1   :  { %12 = vsyncpa [#allocation5], 0  ;;  %s21_s23 = sshll.u32 %s3123_s2, 4  ;;  %s1989_s24 = smov [#allocation3]   ;;  %s22_s23 = int_to_ptr.hbm [resolvable:$true] %s21_s23 }
   0x2   :  { %s23_s25 = sshll.u32 %s1989_s24, 4  ;;  %s1990_s26 = smov 512   ;;  %s24_s25 = int_to_ptr.vmem [resolvable:$true] %s23_s25 }
   0x3   :  { %s1991_s27 = smov 32  }
   0x4   :  { %29 = dma.hbm_to_vmem [thread:$0]  %s22_s23, 8192, %s24_s25, [#allocation4], %s1990_s26, %s1990_s26, %s1991_s27  }
   0x5   :  { %1985 = dma.done.wait [#allocation4], 8192  }
   0x6   :  { %1986 = vsyncadd [#allocation4], 4294959104  ;;  %vm99_vm0 = vcmask 1043456   ;;  %v60_v0 = vld [vmem:[%s3122_s1 + $0x60] sm:$0xf]  ;;  %vm74_vm1 = vcmask 228352  }
   0x7   :  { %v56_v1 = vld [vmem:[%s3122_s1 + $0x40] sm:$0xff]  ;;  %1663 = vmatpush.msk.msra.mxu0 %vm99_vm0, %v60_v0  ;;  %1723 = vmatpush.msk.msra.mxu1 %vm99_vm0, %v60_v0  ;;  %v2054_v5 = vld [vmem:[%s3121_s0 + $0x28] sm:$0xff]  ;;  %v2059_v6 = vld [vmem:[%s3121_s0 + $0x30] sm:$0xff]  ;;  %s1653_s8 = sshll.u32 %s3127_s6, 4  ;;  %s1654_s8 = int_to_ptr.hbm [resolvable:$true] %s1653_s8 }
   0x8   :  { %1724 = vmatpush.msk.msra.mxu2 %vm99_vm0, %v60_v0  ;;  %1725 = vmatpush.msk.msra.mxu3 %vm99_vm0, %v60_v0  ;;  %v52_v2 = vld [vmem:[%s3122_s1 + $0x20] sm:$0xff]  ;;  %v2064_v7 = vld [vmem:[%s3121_s0 + $0x38] sm:$0xff]  ;;  %v61_v8 = vld [vmem:[%s3122_s1 + $0x68] sm:$0xf] }
   0x9   :  { %125 = vmatpush.msra.mxu0 %v56_v1  ;;  %1726 = vmatpush.msra.mxu1 %v56_v1  ;;  %v48_v3 = vld [vmem:[%s3122_s1] sm:$0xff]  ;;  %v62_v9 = vld [vmem:[%s3122_s1 + $0x70] sm:$0xf]  ;;  %v63_v10 = vld [vmem:[%s3122_s1 + $0x78] sm:$0xf] }
   0xa   :  { %1727 = vmatpush.msra.mxu2 %v56_v1  ;;  %1728 = vmatpush.msra.mxu3 %v56_v1  ;;  %v40_v4 = vld [vmem:[%s3121_s0] sm:$0xff]  ;;  %v57_v12 = vld [vmem:[%s3122_s1 + $0x48] sm:$0xff]  ;;  %v58_v13 = vld [vmem:[%s3122_s1 + $0x50] sm:$0xff] }
   0xb   :  { %126 = vmatpush.msra.mxu0 %v52_v2  ;;  %1729 = vmatpush.msra.mxu1 %v52_v2  ;;  %v2078_v11 = vld [vmem:[#allocation3 + $0x1e0] sm:$0xff]  ;;  %v59_v14 = vld [vmem:[%s3122_s1 + $0x58] sm:$0xff]  ;;  %v53_v16 = vld [vmem:[%s3122_s1 + $0x28] sm:$0xff] }
   0xc   :  { %1730 = vmatpush.msra.mxu2 %v52_v2  ;;  %1731 = vmatpush.msra.mxu3 %v52_v2  ;;  %3228 = vst [vmem:[#allocation9_spill] sm:$0xff] %v2078_v11  ;;  %v2095_v15 = vld [vmem:[#allocation3 + $0x1c0] sm:$0xff]  ;;  %v54_v17 = vld [vmem:[%s3122_s1 + $0x30] sm:$0xff]  ;;  %v55_v18 = vld [vmem:[%s3122_s1 + $0x38] sm:$0xff] }
   0xd   :  { %127 = vmatpush.msra.mxu0 %v48_v3  ;;  %1732 = vmatpush.msra.mxu1 %v48_v3  ;;  %v2108_v19 = vld [vmem:[#allocation3 + $0x1a0] sm:$0xff]  ;;  %v49_v20 = vld [vmem:[%s3122_s1 + $0x8] sm:$0xff]  ;;  %v50_v21 = vld [vmem:[%s3122_s1 + $0x10] sm:$0xff] }
   0xe   :  { %1733 = vmatpush.msra.mxu2 %v48_v3  ;;  %1734 = vmatpush.msra.mxu3 %v48_v3  ;;  %v51_v22 = vld [vmem:[%s3122_s1 + $0x18] sm:$0xff]  ;;  %v41_v23 = vld [vmem:[%s3121_s0 + $0x8] sm:$0xff]  ;;  %v2129_v26 = vld [vmem:[#allocation3 + $0x180] sm:$0xff] }
   0xf   :  { %1664 = vmatmul.msk.f32.vlgmr.msra.gmra.mxu0 %vm74_vm1, %v40_v4  ;;  %1669 = vmatmul.msk.f32.vlgmr.msra.gmra.mxu1 %vm74_vm1, %v2054_v5  ;;  %v2124_v24 = vld [vmem:[#allocation3 + $0x1e8] sm:$0xff]  ;;  %v2127_v25 = vld [vmem:[#allocation3 + $0x1f8] sm:$0xff]  ;;  %v2135_v28 = vld [vmem:[#allocation3 + $0x1f0] sm:$0xff] }
  0x10   :  { %1670 = vmatmul.msk.f32.vlgmr.msra.gmra.mxu2 %vm74_vm1, %v2059_v6  ;;  %1671 = vmatmul.msk.f32.vlgmr.msra.gmra.mxu3 %vm74_vm1, %v2064_v7  ;;  %v2133_v27 = vld [vmem:[#allocation3 + $0x1c8] sm:$0xff]  ;;  %v2139_v29 = vld [vmem:[#allocation3 + $0x160] sm:$0xff]  ;;  %v2141_v30 = vld [vmem:[#allocation3 + $0x1d8] sm:$0xff] }
  0x11   :  { %1672 = vmatpush.msk.msrb.mxu1 %vm99_vm0, %v61_v8  ;;  %1681 = vmatpush.msk.msrb.mxu2 %vm99_vm0, %v62_v9  ;;  %v2145_v31 = vld [vmem:[#allocation3 + $0x1a8] sm:$0xff]  ;;  %v2147_v32 = vld [vmem:[#allocation3 + $0x1d0] sm:$0xff]  ;;  %v2150_v33 = vld [vmem:[#allocation3 + $0x140] sm:$0xff] }
  0x12   :  { %1690 = vmatpush.msk.msrb.mxu3 %vm99_vm0, %v63_v10  ;;  %376 = vmatpush.msrb.mxu0 %v2078_v11  ;;  %v2152_v34 = vld [vmem:[#allocation3 + $0x1b8] sm:$0xff]  ;;  %v42_v35 = vld [vmem:[%s3121_s0 + $0x10] sm:$0xff]  ;;  %v2160_v36 = vld [vmem:[#allocation3 + $0x188] sm:$0xff] }
  0x13   :  { %166 = vmatpush.msrb.mxu1 %v57_v12  ;;  %207 = vmatpush.msrb.mxu2 %v58_v13  ;;  %v2165_v37 = vld [vmem:[#allocation3 + $0x120] sm:$0xff]  ;;  %v2170_v38 = vld [vmem:[#allocation3 + $0x168] sm:$0xff]  ;;  %v2172_v39 = vld [vmem:[#allocation3 + $0x198] sm:$0xff] }
  0x14   :  { %248 = vmatpush.msrb.mxu3 %v59_v14  ;;  %377 = vmatpush.msrb.mxu0 %v2095_v15  ;;  %v2176_v40 = vld [vmem:[#allocation3 + $0x100] sm:$0xff]  ;;  %v2178_v41 = vld [vmem:[#allocation3 + $0x1b0] sm:$0xff]  ;;  %v2182_v42 = vld [vmem:[#allocation3 + $0x148] sm:$0xff] }
  0x15   :  { %167 = vmatpush.msrb.mxu1 %v53_v16  ;;  %208 = vmatpush.msrb.mxu2 %v54_v17  ;;  %v2184_v43 = vld [vmem:[#allocation3 + $0x178] sm:$0xff]  ;;  %v2187_v44 = vld [vmem:[#allocation3 + $0xe0] sm:$0xff]  ;;  %v2190_v45 = vld [vmem:[#allocation3 + $0x190] sm:$0xff] }
  0x16   :  { %249 = vmatpush.msrb.mxu3 %v55_v18  ;;  %378 = vmatpush.msrb.mxu0 %v2108_v19  ;;  %v2194_v46 = vld [vmem:[#allocation3 + $0x128] sm:$0xff]  ;;  %v2196_v47 = vld [vmem:[#allocation3 + $0x158] sm:$0xff]  ;;  %v2203_v49 = vld [vmem:[#allocation3 + $0x170] sm:$0xff] }
  0x17   :  { %168 = vmatpush.msrb.mxu1 %v49_v20  ;;  %209 = vmatpush.msrb.mxu2 %v50_v21  ;;  %v43_v48 = vld [vmem:[%s3121_s0 + $0x18] sm:$0xff]  ;;  %v2207_v50 = vld [vmem:[#allocation3 + $0xc0] sm:$0xff]  ;;  %v2212_v51 = vld [vmem:[#allocation3 + $0x108] sm:$0xff]  ;;  %v3130_v21 = vmov 0.0  }
  0x18   :  { %250 = vmatpush.msrb.mxu3 %v51_v22  ;;  %1665 = vmatmul.msk.f32.gmra.mxu0 %vm74_vm1, %v41_v23  ;;  %v2214_v52 = vld [vmem:[#allocation3 + $0x138] sm:$0xff]  ;;  %v2219_v53 = vld [vmem:[#allocation3 + $0xa0] sm:$0xff]  ;;  %v2221_v54 = vld [vmem:[#allocation3 + $0x150] sm:$0xff] }
  0x19   :  { %1673 = vmatmul.msk.f32.vlgmr.msrb.gmra.mxu1 %vm74_vm1, %v40_v4  ;;  %1682 = vmatmul.msk.f32.vlgmr.msrb.gmra.mxu2 %vm74_vm1, %v40_v4  ;;  %3229 = vst [vmem:[#allocation10_spill] sm:$0xff] %v2219_v53  ;;  %v2225_v55 = vld [vmem:[#allocation3 + $0xe8] sm:$0xff]  ;;  %v2227_v56 = vld [vmem:[#allocation3 + $0x118] sm:$0xff]  ;;  %v2229_v57 = vld [vmem:[#allocation3 + $0x80] sm:$0xff] }
  0x1a   :  { %1691 = vmatmul.msk.f32.vlgmr.msrb.gmra.mxu3 %vm74_vm1, %v40_v4  ;;  %396 = vmatpush.msra.mxu1 %v2124_v24  ;;  %3230 = vst [vmem:[#allocation11_spill] sm:$0xff] %v2229_v57  ;;  %v2233_v58 = vld [vmem:[#allocation3 + $0x130] sm:$0xff]  ;;  %v2237_v59 = vld [vmem:[#allocation3 + $0xc8] sm:$0xff]  ;;  %v2239_v60 = vld [vmem:[#allocation3 + $0xf8] sm:$0xff] }
  0x1b   :  { %436 = vmatpush.msra.mxu3 %v2127_v25  ;;  %379 = vmatpush.msrb.mxu0 %v2129_v26  ;;  %v44_v61 = vld [vmem:[%s3121_s0 + $0x20] sm:$0xff]  ;;  %v2246_v62 = vld [vmem:[#allocation3 + $0x110] sm:$0xff]  ;;  %v2255_v0 = vld [vmem:[#allocation3 + $0xa8] sm:$0xff] }
  0x1c   :  { %397 = vmatpush.msra.mxu1 %v2133_v27  ;;  %416 = vmatpush.msra.mxu2 %v2135_v28  ;;  %v2250_v63 = vld [vmem:[#allocation3 + $0x60] sm:$0xff]  ;;  %3232 = vst [vmem:[#allocation13_spill] sm:$0xff] %v2255_v0  ;;  %v2257_v1 = vld [vmem:[#allocation3 + $0xd8] sm:$0xff]  ;;  %v2264_v3 = vld [vmem:[#allocation3 + $0xf0] sm:$0xff] }
  0x1d   :  { %380 = vmatpush.msrb.mxu0 %v2139_v29  ;;  %437 = vmatpush.msra.mxu3 %v2141_v30  ;;  %3231 = vst [vmem:[#allocation12_spill] sm:$0xff] %v2250_v63  ;;  %v2262_v2 = vld [vmem:[#allocation3 + $0x40] sm:$0xff]  ;;  %v2268_v4 = vld [vmem:[#allocation3 + $0x88] sm:$0xff]  ;;  %v2270_v8 = vld [vmem:[#allocation3 + $0xb8] sm:$0xff] }
  0x1e   :  { %398 = vmatpush.msra.mxu1 %v2145_v31  ;;  %417 = vmatpush.msra.mxu2 %v2147_v32  ;;  %3233 = vst [vmem:[#allocation14_spill] sm:$0xff] %v2257_v1  ;;  %v2272_v9 = vld [vmem:[#allocation3 + $0x20] sm:$0xff]  ;;  %v2276_v10 = vld [vmem:[#allocation3 + $0xd0] sm:$0xff]  ;;  %v2280_v12 = vld [vmem:[#allocation3 + $0x68] sm:$0xff] }
  0x1f   :  { %381 = vmatpush.msrb.mxu0 %v2150_v33  ;;  %438 = vmatpush.msra.mxu3 %v2152_v34  ;;  %3234 = vst [vmem:[#allocation15_spill] sm:$0xff] %v2262_v2  ;;  %v2282_v13 = vld [vmem:[#allocation3 + $0x98] sm:$0xff]  ;;  %v2284_v14 = vld [vmem:[#allocation3] sm:$0xff]  ;;  %v2288_v16 = vld [vmem:[#allocation3 + $0xb0] sm:$0xff] }
  0x20   :  { %1666 = vmatmul.msk.f32.gmra.mxu0 %vm74_vm1, %v42_v35  ;;  %399 = vmatpush.msra.mxu1 %v2160_v36  ;;  %3235 = vst [vmem:[#allocation16_spill] sm:$0xff] %v2268_v4  ;;  %v2295_v17 = vld [vmem:[#allocation3 + $0x48] sm:$0xff]  ;;  %v2298_v18 = vld [vmem:[#allocation3 + $0x78] sm:$0xff]  ;;  %v2302_v20 = vld [vmem:[#allocation3 + $0x90] sm:$0xff] }
  0x21   :  { %1674 = vmatmul.msk.f32.gmra.mxu1 %vm74_vm1, %v41_v23  ;;  %1683 = vmatmul.msk.f32.gmra.mxu2 %vm74_vm1, %v41_v23  ;;  %3236 = vst [vmem:[#allocation17_spill] sm:$0xff] %v2270_v8  ;;  %v2306_v22 = vld [vmem:[#allocation3 + $0x28] sm:$0xff] }
  0x22   :  { %1692 = vmatmul.msk.f32.gmra.mxu3 %vm74_vm1, %v41_v23  ;;  %382 = vmatpush.msrb.mxu0 %v2165_v37  ;;  %3237 = vst [vmem:[#allocation18_spill] sm:$0xff] %v2272_v9  ;;  %v2308_v23 = vld [vmem:[#allocation3 + $0x58] sm:$0xff] }
  0x23   :  { %400 = vmatpush.msra.mxu1 %v2170_v38  ;;  %439 = vmatpush.msra.mxu3 %v2172_v39  ;;  %3238 = vst [vmem:[#allocation19_spill] sm:$0xff] %v2276_v10 }
  0x24   :  { %383 = vmatpush.msrb.mxu0 %v2176_v40  ;;  %418 = vmatpush.msra.mxu2 %v2178_v41  ;;  %3239 = vst [vmem:[#allocation20_spill] sm:$0xff] %v2280_v12 }
  0x25   :  { %401 = vmatpush.msra.mxu1 %v2182_v42  ;;  %440 = vmatpush.msra.mxu3 %v2184_v43  ;;  %3240 = vst [vmem:[#allocation21_spill] sm:$0xff] %v2282_v13 }
  0x26   :  { %384 = vmatpush.msrb.mxu0 %v2187_v44  ;;  %419 = vmatpush.msra.mxu2 %v2190_v45  ;;  %3241 = vst [vmem:[#allocation22_spill] sm:$0xff] %v2284_v14 }
  0x27   :  { %402 = vmatpush.msra.mxu1 %v2194_v46  ;;  %441 = vmatpush.msra.mxu3 %v2196_v47  ;;  %3242 = vst [vmem:[#allocation23_spill] sm:$0xff] %v2288_v16 }
  0x28   :  { %1667 = vmatmul.msk.f32.gmra.mxu0 %vm74_vm1, %v43_v48  ;;  %420 = vmatpush.msra.mxu2 %v2203_v49  ;;  %3243 = vst [vmem:[#allocation24_spill] sm:$0xff] %v2295_v17 }
  0x29   :  { %1675 = vmatmul.msk.f32.gmra.mxu1 %vm74_vm1, %v42_v35  ;;  %1684 = vmatmul.msk.f32.gmra.mxu2 %vm74_vm1, %v42_v35  ;;  %3244 = vst [vmem:[#allocation25_spill] sm:$0xff] %v2298_v18 }
  0x2a   :  { %1693 = vmatmul.msk.f32.gmra.mxu3 %vm74_vm1, %v42_v35  ;;  %385 = vmatpush.msrb.mxu0 %v2207_v50  ;;  %3245 = vst [vmem:[#allocation26_spill] sm:$0xff] %v2302_v20  ;;  %v2312_v35 = vld [vmem:[#allocation3 + $0x70] sm:$0xff] }
  0x2b   :  { %403 = vmatpush.msra.mxu1 %v2212_v51  ;;  %442 = vmatpush.msra.mxu3 %v2214_v52  ;;  %3246 = vst [vmem:[#allocation27_spill] sm:$0xff] %v2306_v22 }
  0x2c   :  { %386 = vmatpush.msrb.mxu0 %v2219_v53  ;;  %421 = vmatpush.msra.mxu2 %v2221_v54  ;;  %3247 = vst [vmem:[#allocation28_spill] sm:$0xff] %v2308_v23 }
  0x2d   :  { %404 = vmatpush.msra.mxu1 %v2225_v55  ;;  %443 = vmatpush.msra.mxu3 %v2227_v56  ;;  %3248 = vst [vmem:[#allocation29_spill] sm:$0xff] %v2312_v35 }
  0x2e   :  { %387 = vmatpush.msrb.mxu0 %v2229_v57  ;;  %422 = vmatpush.msra.mxu2 %v2233_v58 }
  0x2f   :  { %405 = vmatpush.msra.mxu1 %v2237_v59  ;;  %444 = vmatpush.msra.mxu3 %v2239_v60 }
  0x30   :  { %1668 = vmatmul.msk.f32.gmra.mxu0 %vm74_vm1, %v44_v61  ;;  %423 = vmatpush.msra.mxu2 %v2246_v62 }
  0x31   :  { %1676 = vmatmul.msk.f32.gmra.mxu1 %vm74_vm1, %v43_v48  ;;  %1685 = vmatmul.msk.f32.gmra.mxu2 %vm74_vm1, %v43_v48 }
  0x32   :  { %1694 = vmatmul.msk.f32.gmra.mxu3 %vm74_vm1, %v43_v48  ;;  %388 = vmatpush.msrb.mxu0 %v2250_v63  ;;  %v2315_v48 = vld [vmem:[#allocation3 + $0x8] sm:$0xff] }
  0x33   :  { %406 = vmatpush.msra.mxu1 %v2255_v0  ;;  %445 = vmatpush.msra.mxu3 %v2257_v1  ;;  %3249 = vst [vmem:[#allocation30_spill] sm:$0xff] %v2315_v48 }
  0x34   :  { %389 = vmatpush.msrb.mxu0 %v2262_v2  ;;  %424 = vmatpush.msra.mxu2 %v2264_v3 }
  0x35   :  { %407 = vmatpush.msra.mxu1 %v2268_v4  ;;  %446 = vmatpush.msra.mxu3 %v2270_v8 }
  0x36   :  { %390 = vmatpush.msrb.mxu0 %v2272_v9  ;;  %425 = vmatpush.msra.mxu2 %v2276_v10  ;;  %v2331_v9 = vld [vmem:[#allocation3 + $0x18] sm:$0xff] }
  0x37   :  { %408 = vmatpush.msra.mxu1 %v2280_v12  ;;  %447 = vmatpush.msra.mxu3 %v2282_v13  ;;  %3253 = vst [vmem:[#allocation34_spill] sm:$0xff] %v2331_v9 }
  0x38   :  { %391 = vmatpush.msrb.mxu0 %v2284_v14  ;;  %426 = vmatpush.msra.mxu2 %v2288_v16  ;;  %v2317_v14 = vld [vmem:[#allocation3 + $0x38] sm:$0xff] }
  0x39   :  { %1677 = vmatmul.msk.f32.gmra.mxu1 %vm74_vm1, %v44_v61  ;;  %1686 = vmatmul.msk.f32.gmra.mxu2 %vm74_vm1, %v44_v61  ;;  %3250 = vst [vmem:[#allocation31_spill] sm:$0xff] %v2317_v14 }
  0x3a   :  { %1695 = vmatmul.msk.f32.gmra.mxu3 %vm74_vm1, %v44_v61  ;;  %392 = vmatmul.f32.vlgmr.msrb.gmra.mxu0 %v3130_v21  ;;  %v2322_v61 = vld [vmem:[#allocation3 + $0x50] sm:$0xff] }
  0x3b   :  { %409 = vmatpush.msra.mxu1 %v2295_v17  ;;  %448 = vmatpush.msra.mxu3 %v2298_v18  ;;  %3251 = vst [vmem:[#allocation32_spill] sm:$0xff] %v2322_v61  ;;  %v2327_v21 = vld [vmem:[#allocation3 + $0x30] sm:$0xff] }
  0x3c   :  { %427 = vmatpush.msra.mxu2 %v2302_v20  ;;  %527 = vmatpush.msra.mxu0 %v2078_v11  ;;  %3252 = vst [vmem:[#allocation33_spill] sm:$0xff] %v2327_v21  ;;  %v2338_v11 = vld [vmem:[#allocation3 + $0x10] sm:$0xff] }
  0x3d   :  { %410 = vmatpush.msra.mxu1 %v2306_v22  ;;  %449 = vmatpush.msra.mxu3 %v2308_v23  ;;  %3254 = vst [vmem:[#allocation35_spill] sm:$0xff] %v2338_v11 }
  0x3e   :  { %428 = vmatpush.msra.mxu2 %v2312_v35  ;;  %528 = vmatpush.msra.mxu0 %v2095_v15 }
  0x3f   :  { %411 = vmatpush.msra.mxu1 %v2315_v48  ;;  %450 = vmatpush.msra.mxu3 %v2317_v14 }
  0x40   :  { %429 = vmatpush.msra.mxu2 %v2322_v61  ;;  %529 = vmatpush.msra.mxu0 %v2108_v19 }
  0x41   :  { %547 = vmatpush.msrb.mxu1 %v2124_v24  ;;  %1687 = vmatmul.msk.f32.gmra.mxu2 %vm74_vm1, %v2054_v5 }
  0x42   :  { %1678 = vmatmul.msk.f32.gmra.mxu1 %vm74_vm1, %v2054_v5  ;;  %1696 = vmatmul.msk.f32.gmra.mxu3 %vm74_vm1, %v2054_v5  ;;  %v3255_v5 = vmov 0.0  }
  0x43   :  { %430 = vmatpush.msra.mxu2 %v2327_v21  ;;  %451 = vmatpush.msra.mxu3 %v2331_v9 }
  0x44   :  { %548 = vmatpush.msrb.mxu1 %v2133_v27  ;;  %530 = vmatpush.msra.mxu0 %v2129_v26 }
  0x45   :  { %431 = vmatpush.msra.mxu2 %v2338_v11  ;;  %587 = vmatpush.msrb.mxu3 %v2127_v25 }
  0x46   :  { %549 = vmatpush.msrb.mxu1 %v2145_v31  ;;  %531 = vmatpush.msra.mxu0 %v2139_v29 }
  0x47   :  { %567 = vmatpush.msrb.mxu2 %v2135_v28  ;;  %588 = vmatpush.msrb.mxu3 %v2141_v30 }
  0x48   :  { %550 = vmatpush.msrb.mxu1 %v2160_v36  ;;  %532 = vmatpush.msra.mxu0 %v2150_v33 }
  0x49   :  { %568 = vmatpush.msrb.mxu2 %v2147_v32  ;;  %589 = vmatpush.msrb.mxu3 %v2152_v34 }
  0x4a   :  { %1679 = vmatmul.msk.f32.gmra.mxu1 %vm74_vm1, %v2059_v6  ;;  %1688 = vmatmul.msk.f32.gmra.mxu2 %vm74_vm1, %v2059_v6 }
  0x4b   :  { %1697 = vmatmul.msk.f32.gmra.mxu3 %vm74_vm1, %v2059_v6  ;;  %569 = vmatpush.msrb.mxu2 %v2178_v41  ;;  %v3256_v6 = vld [vmem:[#allocation18_spill] sm:$0xff] }
  0x4c   :  { %590 = vmatpush.msrb.mxu3 %v2172_v39  ;;  %551 = vmatpush.msrb.mxu1 %v2170_v38 }
  0x4d   :  { %570 = vmatpush.msrb.mxu2 %v2190_v45  ;;  %533 = vmatpush.msra.mxu0 %v2165_v37 }
  0x4e   :  { %591 = vmatpush.msrb.mxu3 %v2184_v43  ;;  %552 = vmatpush.msrb.mxu1 %v2182_v42 }
  0x4f   :  { %571 = vmatpush.msrb.mxu2 %v2203_v49  ;;  %534 = vmatpush.msra.mxu0 %v2176_v40 }
  0x50   :  { %592 = vmatpush.msrb.mxu3 %v2196_v47  ;;  %553 = vmatpush.msrb.mxu1 %v2194_v46 }
  0x51   :  { %572 = vmatpush.msrb.mxu2 %v2221_v54  ;;  %535 = vmatpush.msra.mxu0 %v2187_v44 }
  0x52   :  { %1680 = vmatmul.msk.f32.gmra.mxu1 %vm74_vm1, %v2064_v7  ;;  %1689 = vmatmul.msk.f32.gmra.mxu2 %vm74_vm1, %v2064_v7 }
  0x53   :  { %1698 = vmatmul.msk.f32.gmra.mxu3 %vm74_vm1, %v2064_v7  ;;  %573 = vmatpush.msrb.mxu2 %v2233_v58  ;;  %v3257_v7 = vld [vmem:[#allocation22_spill] sm:$0xff] }
  0x54   :  { %593 = vmatpush.msrb.mxu3 %v2214_v52  ;;  %554 = vmatpush.msrb.mxu1 %v2212_v51 }
  0x55   :  { %574 = vmatpush.msrb.mxu2 %v2246_v62  ;;  %536 = vmatpush.msra.mxu0 %v2207_v50 }
  0x56   :  { %594 = vmatpush.msrb.mxu3 %v2227_v56  ;;  %555 = vmatpush.msrb.mxu1 %v2225_v55 }
  0x57   :  { %575 = vmatpush.msrb.mxu2 %v2264_v3  ;;  %537 = vmatpush.msra.mxu0 %v2219_v53 }
  0x58   :  { %595 = vmatpush.msrb.mxu3 %v2239_v60  ;;  %556 = vmatpush.msrb.mxu1 %v2237_v59 }
  0x59   :  { %576 = vmatpush.msrb.mxu2 %v2276_v10  ;;  %538 = vmatpush.msra.mxu0 %v2229_v57 }
  0x5a   :  { %412 = vmatmul.f32.vlgmr.msra.gmra.mxu1 %v3255_v5  ;;  %432 = vmatmul.f32.vlgmr.msra.gmra.mxu2 %v3255_v5 }
  0x5b   :  { %452 = vmatmul.f32.vlgmr.msra.gmra.mxu3 %v3255_v5  ;;  %557 = vmatpush.msrb.mxu1 %v2255_v0  ;;  %v3258_v5 = vld [vmem:[#allocation9_spill] sm:$0xff] }
  0x5c   :  { %596 = vmatpush.msrb.mxu3 %v2257_v1  ;;  %577 = vmatpush.msrb.mxu2 %v2288_v16 }
  0x5d   :  { %558 = vmatpush.msrb.mxu1 %v2268_v4  ;;  %539 = vmatpush.msra.mxu0 %v2250_v63 }
  0x5e   :  { %597 = vmatpush.msrb.mxu3 %v2270_v8  ;;  %578 = vmatpush.msrb.mxu2 %v2302_v20 }
  0x5f   :  { %559 = vmatpush.msrb.mxu1 %v2280_v12  ;;  %540 = vmatpush.msra.mxu0 %v2262_v2 }
  0x60   :  { %598 = vmatpush.msrb.mxu3 %v2282_v13  ;;  %579 = vmatpush.msrb.mxu2 %v2312_v35 }
  0x61   :  { %560 = vmatpush.msrb.mxu1 %v2295_v17  ;;  %541 = vmatpush.msra.mxu0 %v3256_v6 }
  0x62   :  { %599 = vmatpush.msrb.mxu3 %v2298_v18  ;;  %580 = vmatpush.msrb.mxu2 %v2322_v61 }
  0x63   :  { %561 = vmatpush.msrb.mxu1 %v2306_v22  ;;  %542 = vmatpush.msra.mxu0 %v3257_v7 }
  0x64   :  { %600 = vmatpush.msrb.mxu3 %v2308_v23  ;;  %581 = vmatpush.msrb.mxu2 %v2327_v21 }
  0x65   :  { %562 = vmatpush.msrb.mxu1 %v2315_v48  ;;  %678 = vmatpush.msrb.mxu0 %v3258_v5 }
  0x66   :  { %601 = vmatpush.msrb.mxu3 %v2317_v14  ;;  %582 = vmatpush.msrb.mxu2 %v2338_v11 }
  0x67   :  { %698 = vmatpush.msra.mxu1 %v2124_v24  ;;  %679 = vmatpush.msrb.mxu0 %v2095_v15 }
  0x68   :  { %602 = vmatpush.msrb.mxu3 %v2331_v9  ;;  %718 = vmatpush.msra.mxu2 %v2135_v28 }
  0x69   :  { %699 = vmatpush.msra.mxu1 %v2133_v27  ;;  %680 = vmatpush.msrb.mxu0 %v2108_v19 }
  0x6a   :  { %738 = vmatpush.msra.mxu3 %v2127_v25  ;;  %719 = vmatpush.msra.mxu2 %v2147_v32 }
  0x6b   :  { %700 = vmatpush.msra.mxu1 %v2145_v31  ;;  %681 = vmatpush.msrb.mxu0 %v2129_v26 }
  0x6c   :  { %739 = vmatpush.msra.mxu3 %v2141_v30  ;;  %720 = vmatpush.msra.mxu2 %v2178_v41 }
  0x6d   :  { %701 = vmatpush.msra.mxu1 %v2160_v36  ;;  %682 = vmatpush.msrb.mxu0 %v2139_v29 }
  0x6e   :  { %740 = vmatpush.msra.mxu3 %v2152_v34  ;;  %721 = vmatpush.msra.mxu2 %v2190_v45 }
  0x6f   :  { %702 = vmatpush.msra.mxu1 %v2170_v38  ;;  %683 = vmatpush.msrb.mxu0 %v2150_v33 }
  0x70   :  { %741 = vmatpush.msra.mxu3 %v2172_v39  ;;  %722 = vmatpush.msra.mxu2 %v2203_v49 }
  0x71   :  { %703 = vmatpush.msra.mxu1 %v2182_v42  ;;  %684 = vmatpush.msrb.mxu0 %v2165_v37 }
  0x72   :  { %742 = vmatpush.msra.mxu3 %v2184_v43  ;;  %723 = vmatpush.msra.mxu2 %v2221_v54 }
  0x73   :  { %704 = vmatpush.msra.mxu1 %v2194_v46  ;;  %685 = vmatpush.msrb.mxu0 %v2176_v40 }
  0x74   :  { %743 = vmatpush.msra.mxu3 %v2196_v47  ;;  %724 = vmatpush.msra.mxu2 %v2233_v58 }
  0x75   :  { %705 = vmatpush.msra.mxu1 %v2212_v51  ;;  %686 = vmatpush.msrb.mxu0 %v2187_v44 }
  0x76   :  { %744 = vmatpush.msra.mxu3 %v2214_v52  ;;  %725 = vmatpush.msra.mxu2 %v2246_v62 }
  0x77   :  { %706 = vmatpush.msra.mxu1 %v2225_v55  ;;  %687 = vmatpush.msrb.mxu0 %v2207_v50 }
  0x78   :  { %745 = vmatpush.msra.mxu3 %v2227_v56  ;;  %726 = vmatpush.msra.mxu2 %v2264_v3 }
  0x79   :  { %707 = vmatpush.msra.mxu1 %v2237_v59  ;;  %688 = vmatpush.msrb.mxu0 %v2219_v53 }
  0x7a   :  { %746 = vmatpush.msra.mxu3 %v2239_v60  ;;  %727 = vmatpush.msra.mxu2 %v2276_v10 }
  0x7b   :  { %708 = vmatpush.msra.mxu1 %v2255_v0  ;;  %689 = vmatpush.msrb.mxu0 %v2229_v57 }
  0x7c   :  { %747 = vmatpush.msra.mxu3 %v2257_v1  ;;  %728 = vmatpush.msra.mxu2 %v2288_v16 }
  0x7d   :  { %709 = vmatpush.msra.mxu1 %v2268_v4  ;;  %690 = vmatpush.msrb.mxu0 %v2250_v63 }
  0x7e   :  { %748 = vmatpush.msra.mxu3 %v2270_v8  ;;  %729 = vmatpush.msra.mxu2 %v2302_v20 }
  0x7f   :  { %710 = vmatpush.msra.mxu1 %v2280_v12  ;;  %691 = vmatpush.msrb.mxu0 %v2262_v2 }
  0x80   :  { %749 = vmatpush.msra.mxu3 %v2282_v13  ;;  %730 = vmatpush.msra.mxu2 %v2312_v35 }
  0x81   :  { %711 = vmatpush.msra.mxu1 %v2295_v17  ;;  %692 = vmatpush.msrb.mxu0 %v3256_v6  ;;  %v64_v17 = vld [vmem:[%s3124_s3] sm:$0xf] }
  0x82   :  { %750 = vmatpush.msra.mxu3 %v2298_v18  ;;  %731 = vmatpush.msra.mxu2 %v2322_v61  ;;  %v2504_v20 = vperm.slane %v64_v17, 2 }
  0x83   :  { %712 = vmatpush.msra.mxu1 %v2306_v22  ;;  %693 = vmatpush.msrb.mxu0 %v3257_v7 }
  0x84   :  { %751 = vmatpush.msra.mxu3 %v2308_v23  ;;  %732 = vmatpush.msra.mxu2 %v2327_v21  ;;  %v66_v23 = vperm.slane %v64_v17, 0 }
  0x85   :  { %713 = vmatpush.msra.mxu1 %v2315_v48 }
  0x86   :  { %752 = vmatpush.msra.mxu3 %v2317_v14  ;;  %733 = vmatpush.msra.mxu2 %v2338_v11  ;;  %v67_v11 = vperm.slane %v64_v17, 1 }
  0x88   :  { %753 = vmatpush.msra.mxu3 %v2331_v9 }
  0x8c   :  { %v129_v6 = vpop.f32.mrf.mxu0  ;;  %v144_v61 = vpop.f32.mrf.mxu1 }
  0x8d   :  { %v2488_v22 = vadd.f32 %v144_v61, %v66_v23 }
  0x8f   :  { %3259 = vst [vmem:[#allocation9_spill] sm:$0xff] %v2488_v22 }
  0x93   :  { %v147_v21 = vpop.f32.mrf.mxu2  ;;  %v150_v2 = vpop.f32.mrf.mxu3 }
  0x94   :  { %v2490_v14 = vadd.f32 %v147_v21, %v66_v23  ;;  %v2492_v7 = vadd.f32 %v150_v2, %v66_v23  ;;  %v69_v21 = vperm.slane %v64_v17, 3 }
  0x95   :  { %v132_v48 = vpop.f32.mrf.mxu0 }
  0x96   :  { %3260 = vst [vmem:[#allocation36_spill] sm:$0xff] %v2490_v14  ;;  %v2494_v18 = vadd.f32 %v132_v48, %v66_v23  ;;  %v170_v35 = vpop.f32.mrf.mxu1 }
  0x97   :  { %3261 = vst [vmem:[#allocation37_spill] sm:$0xff] %v2492_v7 }
  0x98   :  { %3262 = vst [vmem:[#allocation38_spill] sm:$0xff] %v2494_v18 }
  0x9c   :  { %v2496_v12 = vpop.f32.mrf.mxu2 }
  0x9d   :  { %v2498_v63 = vpop.f32.mrf.mxu3  ;;  %v135_v9 = vpop.f32.mrf.mxu0 }
  0x9e   :  { %v2500_v13 = vadd.f32 %v135_v9, %v66_v23  ;;  %v173_v61 = vpop.f32.mrf.mxu1 }
  0x9f   :  { %v2502_v22 = vadd.f32 %v173_v61, %v67_v11 }
  0xa0   :  { %3263 = vst [vmem:[#allocation39_spill] sm:$0xff] %v2500_v13 }
  0xa1   :  { %3264 = vst [vmem:[#allocation40_spill] sm:$0xff] %v2502_v22 }
  0xa4   :  { %v214_v2 = vpop.f32.mrf.mxu2 }
  0xa5   :  { %v2507_v7 = vadd.f32 %v214_v2, %v2504_v20  ;;  %v255_v48 = vpop.f32.mrf.mxu3  ;;  %v138_v14 = vpop.f32.mrf.mxu0 }
  0xa6   :  { %v2509_v18 = vadd.f32 %v255_v48, %v69_v21  ;;  %v2511_v4 = vadd.f32 %v138_v14, %v66_v23  ;;  %v176_v57 = vpop.f32.mrf.mxu1 }
  0xa7   :  { %3265 = vst [vmem:[#allocation41_spill] sm:$0xff] %v2507_v7  ;;  %v2513_v8 = vadd.f32 %v176_v57, %v67_v11 }
  0xa8   :  { %3266 = vst [vmem:[#allocation42_spill] sm:$0xff] %v2509_v18 }
  0xa9   :  { %3267 = vst [vmem:[#allocation43_spill] sm:$0xff] %v2511_v4 }
  0xaa   :  { %3268 = vst [vmem:[#allocation44_spill] sm:$0xff] %v2513_v8 }
  0xac   :  { %v217_v9 = vpop.f32.mrf.mxu2 }
  0xad   :  { %v2516_v61 = vadd.f32 %v217_v9, %v2504_v20  ;;  %v258_v13 = vpop.f32.mrf.mxu3  ;;  %v141_v22 = vpop.f32.mrf.mxu0 }
  0xae   :  { %v2518_v17 = vadd.f32 %v258_v13, %v69_v21  ;;  %v2520_v16 = vadd.f32 %v141_v22, %v66_v23  ;;  %v179_v2 = vpop.f32.mrf.mxu1 }
  0xaf   :  { %3269 = vst [vmem:[#allocation45_spill] sm:$0xff] %v2516_v61  ;;  %v2522_v7 = vadd.f32 %v179_v2, %v67_v11 }
  0xb0   :  { %3270 = vst [vmem:[#allocation46_spill] sm:$0xff] %v2518_v17  ;;  %v130_v17 = vadd.f32 %v129_v6, %v66_v23 }
  0xb1   :  { %3271 = vst [vmem:[#allocation47_spill] sm:$0xff] %v2520_v16 }
  0xb2   :  { %3272 = vst [vmem:[#allocation48_spill] sm:$0xff] %v2522_v7 }
  0xb4   :  { %v220_v48 = vpop.f32.mrf.mxu2 }
  0xb5   :  { %v2525_v14 = vadd.f32 %v220_v48, %v2504_v20  ;;  %v261_v4 = vpop.f32.mrf.mxu3 }
  0xb6   :  { %v2527_v57 = vadd.f32 %v261_v4, %v69_v21  ;;  %v182_v8 = vpop.f32.mrf.mxu1 }
  0xb7   :  { %3273 = vst [vmem:[#allocation49_spill] sm:$0xff] %v2525_v14  ;;  %v2529_v18 = vadd.f32 %v182_v8, %v67_v11  ;;  %v393_v7 = vpop.f32.mrf.mxu0 }
  0xb8   :  { %3274 = vst [vmem:[#allocation50_spill] sm:$0xff] %v2527_v57  ;;  %v456_v48 = vadd.f32 %v393_v7, %v130_v17 }
  0xb9   :  { %3275 = vst [vmem:[#allocation51_spill] sm:$0xff] %v2529_v18 }
  0xba   :  { %v1699_v0 = vmul.f32 -1.442695, %v456_v48 }
  0xbc   :  { %v223_v9 = vpop.f32.mrf.mxu2  ;;  %1741 = vpow2.f32 %v1699_v0 }
  0xbd   :  { %v2532_v61 = vadd.f32 %v223_v9, %v2504_v20  ;;  %v264_v13 = vpop.f32.mrf.mxu3 }
  0xbe   :  { %v2534_v22 = vadd.f32 %v264_v13, %v69_v21 }
  0xbf   :  { %3276 = vst [vmem:[#allocation52_spill] sm:$0xff] %v2532_v61  ;;  %v185_v16 = vpop.f32.mrf.mxu1 }
  0xc0   :  { %3277 = vst [vmem:[#allocation53_spill] sm:$0xff] %v2534_v22  ;;  %v2536_v2 = vadd.f32 %v185_v16, %v67_v11 }
  0xc2   :  { %3278 = vst [vmem:[#allocation54_spill] sm:$0xff] %v2536_v2  ;;  %v1742_v7 = vpop.eup %1741 }
  0xc3   :  { %v463_v17 = vadd.f32 1.0, %v1742_v7 }
  0xc4   :  { %v226_v14 = vpop.f32.mrf.mxu2 }
  0xc5   :  { %v2539_v4 = vadd.f32 %v226_v14, %v2504_v20  ;;  %v267_v57 = vpop.f32.mrf.mxu3  ;;  %1743 = vrcp.f32 %v463_v17  ;;  %vm469_vm3 = vweird.f32 %v463_v17 }
  0xc6   :  { %v2541_v8 = vadd.f32 %v267_v57, %v69_v21  ;;  %v171_v57 = vadd.f32 %v170_v35, %v67_v11 }
  0xc7   :  { %3279 = vst [vmem:[#allocation55_spill] sm:$0xff] %v2539_v4  ;;  %v188_v18 = vpop.f32.mrf.mxu1 }
  0xc8   :  { %3280 = vst [vmem:[#allocation56_spill] sm:$0xff] %v2541_v8  ;;  %v2543_v9 = vadd.f32 %v188_v18, %v67_v11 }
  0xca   :  { %3281 = vst [vmem:[#allocation57_spill] sm:$0xff] %v2543_v9 }
  0xcd   :  { %v229_v13 = vpop.f32.mrf.mxu2 }
  0xce   :  { %v2546_v61 = vadd.f32 %v229_v13, %v2504_v20  ;;  %v270_v16 = vpop.f32.mrf.mxu3 }
  0xcf   :  { %v2548_v2 = vadd.f32 %v270_v16, %v69_v21  ;;  %v191_v23 = vpop.f32.mrf.mxu1  ;;  %v253_v16 = vadd.f32 %v2498_v63, %v69_v21 }
  0xd0   :  { %3282 = vst [vmem:[#allocation58_spill] sm:$0xff] %v2546_v61  ;;  %v2550_v6 = vadd.f32 %v191_v23, %v67_v11  ;;  %v1744_v23 = vpop.eup %1743 }
  0xd1   :  { %3283 = vst [vmem:[#allocation59_spill] sm:$0xff] %v2548_v2  ;;  %v465_v8 = vmul.f32 %v1744_v23, %v463_v17  ;;  %vm470_vm2 = vweird.f32 %v1744_v23 }
  0xd2   :  { %3284 = vst [vmem:[#allocation60_spill] sm:$0xff] %v2550_v6  ;;  %vm471_vm5 = vmor %vm469_vm3, %vm470_vm2 }
  0xd3   :  { %v466_v35 = vsub.f32 1.0, %v465_v8  ;;  %v473_v8 = vand.u32 2147483647, %v463_v17 }
  0xd5   :  { %v232_v14 = vpop.f32.mrf.mxu2  ;;  %vm474_vm8 = vcmp.eq.f32.partialorder %v473_v8, 8.507059e+37 }
  0xd6   :  { %v2553_v4 = vadd.f32 %v232_v14, %v2504_v20  ;;  %v273_v18 = vpop.f32.mrf.mxu3 }
  0xd7   :  { %v2555_v48 = vadd.f32 %v273_v18, %v69_v21  ;;  %v413_v0 = vpop.f32.mrf.mxu1  ;;  %v212_v18 = vadd.f32 %v2496_v12, %v2504_v20 }
  0xd8   :  { %3285 = vst [vmem:[#allocation61_spill] sm:$0xff] %v2553_v4  ;;  %v457_v9 = vadd.f32 %v413_v0, %v171_v57 }
  0xd9   :  { %3286 = vst [vmem:[#allocation62_spill] sm:$0xff] %v2555_v48 }
  0xda   :  { %v1700_v13 = vmul.f32 -1.442695, %v457_v9  ;;  %v467_v9 = vmul.f32 %v1744_v23, %v466_v35 }
  0xdc   :  { %1745 = vpow2.f32 %v1700_v13 }
  0xdd   :  { %v433_v14 = vpop.f32.mrf.mxu2 }
  0xde   :  { %v453_v61 = vpop.f32.mrf.mxu3  ;;  %v458_v0 = vadd.f32 %v433_v14, %v212_v18 }
  0xdf   :  { %v459_v6 = vadd.f32 %v453_v61, %v253_v16  ;;  %v468_v61 = vadd.f32 %v1744_v23, %v467_v9 }
  0xe1   :  { %v1701_v2 = vmul.f32 -1.442695, %v459_v6  ;;  %v472_v20 = vsel %vm471_vm5, %v1744_v23, %v468_v61 }
  0xe2   :  { %v1746_v7 = vpop.eup %1745 }
  0xe3   :  { %v482_v11 = vadd.f32 1.0, %v1746_v7  ;;  %1747 = vpow2.f32 %v1701_v2  ;;  %v475_v2 = vand.u32 2147483648, %v463_v17 }
  0xe5   :  { %1749 = vrcp.f32 %v482_v11  ;;  %v494_v6 = vand.u32 2147483648, %v482_v11  ;;  %v492_v7 = vand.u32 2147483647, %v482_v11  ;;  %vm488_vm6 = vweird.f32 %v482_v11 }
  0xe7   :  { %v495_v18 = vor.u32 1.1754944e-38, %v494_v6  ;;  %vm493_vm9 = vcmp.eq.f32.partialorder %v492_v7, 8.507059e+37 }
  0xe9   :  { %v1748_v57 = vpop.eup %1747 }
  0xea   :  { %v502_v13 = vadd.f32 1.0, %v1748_v57  ;;  %v476_v57 = vor.u32 1.1754944e-38, %v475_v2 }
  0xeb   :  { %v1750_v4 = vpop.eup %1749 }
  0xec   :  { %v484_v63 = vmul.f32 %v1750_v4, %v482_v11  ;;  %1751 = vrcp.f32 %v502_v13  ;;  %vm489_vm4 = vweird.f32 %v1750_v4  ;;  %v514_v23 = vand.u32 2147483648, %v502_v13 }
  0xed   :  { %1753 = vtanh.f32 %v458_v0  ;;  %vm490_vm7 = vmor %vm488_vm6, %vm489_vm4  ;;  %vm508_vm11 = vweird.f32 %v502_v13  ;;  %v512_v11 = vand.u32 2147483647, %v502_v13 }
  0xee   :  { %v485_v21 = vsub.f32 1.0, %v484_v63  ;;  %v477_v63 = vsel %vm474_vm8, %v476_v57, %v472_v20  ;;  %v515_v6 = vor.u32 1.1754944e-38, %v514_v23  ;;  %v3316_v20 = vld [vmem:[#allocation41_spill] sm:$0xff] }
  0xef   :  { %vm513_vm13 = vcmp.eq.f32.partialorder %v512_v11, 8.507059e+37 }
  0xf0   :  { %v486_v16 = vmul.f32 %v1750_v4, %v485_v21 }
  0xf2   :  { %v1752_v12 = vpop.eup %1751  ;;  %v487_v35 = vadd.f32 %v1750_v4, %v486_v16 }
  0xf3   :  { %v1754_v14 = vpop.eup %1753  ;;  %v504_v0 = vmul.f32 %v1752_v12, %v502_v13  ;;  %vm509_vm10 = vweird.f32 %v1752_v12 }
  0xf4   :  { %v491_v9 = vsel %vm490_vm7, %v1750_v4, %v487_v35  ;;  %v519_v17 = vmul.f32 %v1754_v14, %v477_v63  ;;  %vm510_vm12 = vmor %vm508_vm11, %vm509_vm10 }
  0xf5   :  { %v496_v48 = vsel %vm493_vm9, %v495_v18, %v491_v9  ;;  %v505_v22 = vsub.f32 1.0, %v504_v0 }
  0xf6   :  { %v518_v21 = vmul.f32 0.0, %v496_v48 }
  0xf7   :  { %v506_v53 = vmul.f32 %v1752_v12, %v505_v22 }
  0xf8   :  { %v2560_v1 = vadd.f32 %v519_v17, %v518_v21 }
  0xf9   :  { %v507_v10 = vadd.f32 %v1752_v12, %v506_v53 }
  0xfa   :  { %1755 = vtanh.f32 %v2560_v1 }
  0xfb   :  { %v511_v61 = vsel %vm510_vm12, %v1752_v12, %v507_v10 }
  0xfc   :  { %v516_v2 = vsel %vm513_vm13, %v515_v6, %v511_v61 }
 0x100   :  { %v1756_v4 = vpop.eup %1755 }
 0x101   :  { %v522_v16 = vmul.f32 %v1756_v4, %v516_v2 }
 0x103   :  { %543 = vmatmul.f32.vlgmr.msra.gmra.mxu0 %v522_v16  ;;  %563 = vmatmul.f32.vlgmr.msrb.gmra.mxu1 %v522_v16 }
 0x104   :  { %583 = vmatmul.f32.vlgmr.msrb.gmra.mxu2 %v522_v16  ;;  %603 = vmatmul.f32.vlgmr.msrb.gmra.mxu3 %v522_v16 }
 0x105   :  { %829 = vmatpush.msra.mxu0 %v3258_v5  ;;  %849 = vmatpush.msrb.mxu1 %v2124_v24  ;;  %v3289_v24 = vld [vmem:[#allocation10_spill] sm:$0xff] }
 0x106   :  { %869 = vmatpush.msrb.mxu2 %v2135_v28  ;;  %889 = vmatpush.msrb.mxu3 %v2127_v25  ;;  %v3290_v25 = vld [vmem:[#allocation13_spill] sm:$0xff]  ;;  %v3293_v28 = vld [vmem:[#allocation11_spill] sm:$0xff] }
 0x107   :  { %830 = vmatpush.msra.mxu0 %v2095_v15  ;;  %850 = vmatpush.msrb.mxu1 %v2133_v27  ;;  %v3287_v15 = vld [vmem:[#allocation19_spill] sm:$0xff]  ;;  %v3292_v27 = vld [vmem:[#allocation17_spill] sm:$0xff] }
 0x108   :  { %870 = vmatpush.msrb.mxu2 %v2147_v32  ;;  %890 = vmatpush.msrb.mxu3 %v2141_v30  ;;  %v3295_v30 = vld [vmem:[#allocation26_spill] sm:$0xff]  ;;  %v3297_v32 = vld [vmem:[#allocation12_spill] sm:$0xff] }
 0x109   :  { %831 = vmatpush.msra.mxu0 %v2108_v19  ;;  %851 = vmatpush.msrb.mxu1 %v2145_v31  ;;  %v3288_v19 = vld [vmem:[#allocation14_spill] sm:$0xff]  ;;  %v3296_v31 = vld [vmem:[#allocation21_spill] sm:$0xff] }
 0x10a   :  { %871 = vmatpush.msrb.mxu2 %v2178_v41  ;;  %891 = vmatpush.msrb.mxu3 %v2152_v34  ;;  %v3299_v34 = vld [vmem:[#allocation29_spill] sm:$0xff]  ;;  %v3305_v41 = vld [vmem:[#allocation18_spill] sm:$0xff] }
 0x10b   :  { %832 = vmatpush.msra.mxu0 %v2129_v26  ;;  %852 = vmatpush.msrb.mxu1 %v2160_v36  ;;  %v3291_v26 = vld [vmem:[#allocation23_spill] sm:$0xff]  ;;  %v3300_v36 = vld [vmem:[#allocation25_spill] sm:$0xff] }
 0x10c   :  { %872 = vmatpush.msrb.mxu2 %v2190_v45  ;;  %892 = vmatpush.msrb.mxu3 %v2172_v39  ;;  %v3303_v39 = vld [vmem:[#allocation32_spill] sm:$0xff]  ;;  %v3309_v45 = vld [vmem:[#allocation22_spill] sm:$0xff] }
 0x10d   :  { %833 = vmatpush.msra.mxu0 %v2139_v29  ;;  %853 = vmatpush.msrb.mxu1 %v2170_v38  ;;  %v3294_v29 = vld [vmem:[#allocation16_spill] sm:$0xff] }
 0x10e   :  { %873 = vmatpush.msrb.mxu2 %v2203_v49  ;;  %893 = vmatpush.msrb.mxu3 %v2184_v43  ;;  %v3302_v38 = vld [vmem:[#allocation24_spill] sm:$0xff]  ;;  %v3307_v43 = vld [vmem:[#allocation33_spill] sm:$0xff]  ;;  %v3312_v49 = vld [vmem:[#allocation34_spill] sm:$0xff] }
 0x10f   :  { %834 = vmatpush.msra.mxu0 %v2150_v33  ;;  %854 = vmatpush.msrb.mxu1 %v2182_v42  ;;  %v3298_v33 = vld [vmem:[#allocation20_spill] sm:$0xff]  ;;  %v3306_v42 = vld [vmem:[#allocation27_spill] sm:$0xff] }
 0x110   :  { %874 = vmatpush.msrb.mxu2 %v2221_v54  ;;  %894 = vmatpush.msrb.mxu3 %v2196_v47  ;;  %v3311_v47 = vld [vmem:[#allocation35_spill] sm:$0xff]  ;;  %v3314_v54 = vld [vmem:[#allocation40_spill] sm:$0xff] }
 0x111   :  { %835 = vmatpush.msra.mxu0 %v2165_v37  ;;  %855 = vmatpush.msrb.mxu1 %v2194_v46  ;;  %v3301_v37 = vld [vmem:[#allocation15_spill] sm:$0xff]  ;;  %v3310_v46 = vld [vmem:[#allocation30_spill] sm:$0xff] }
 0x112   :  { %875 = vmatpush.msrb.mxu2 %v2233_v58  ;;  %895 = vmatpush.msrb.mxu3 %v2214_v52  ;;  %v3313_v52 = vld [vmem:[#allocation38_spill] sm:$0xff] }
 0x113   :  { %836 = vmatpush.msra.mxu0 %v2176_v40  ;;  %856 = vmatpush.msrb.mxu1 %v2212_v51  ;;  %v3304_v40 = vld [vmem:[#allocation28_spill] sm:$0xff] }
 0x114   :  { %876 = vmatpush.msrb.mxu2 %v2246_v62  ;;  %896 = vmatpush.msrb.mxu3 %v2227_v56 }
 0x115   :  { %837 = vmatpush.msra.mxu0 %v2187_v44  ;;  %857 = vmatpush.msrb.mxu1 %v2225_v55  ;;  %v3308_v44 = vld [vmem:[#allocation31_spill] sm:$0xff] }
 0x116   :  { %877 = vmatpush.msrb.mxu2 %v2264_v3  ;;  %897 = vmatpush.msrb.mxu3 %v2239_v60  ;;  %v3315_v60 = vld [vmem:[#allocation42_spill] sm:$0xff] }
 0x117   :  { %838 = vmatpush.msra.mxu0 %v2207_v50  ;;  %858 = vmatpush.msrb.mxu1 %v2237_v59 }
 0x118   :  { %878 = vmatpush.msrb.mxu2 %v3287_v15  ;;  %898 = vmatpush.msrb.mxu3 %v3288_v19 }
 0x119   :  { %839 = vmatpush.msra.mxu0 %v3289_v24  ;;  %859 = vmatpush.msrb.mxu1 %v3290_v25 }
 0x11a   :  { %879 = vmatpush.msrb.mxu2 %v3291_v26  ;;  %899 = vmatpush.msrb.mxu3 %v3292_v27 }
 0x11b   :  { %840 = vmatpush.msra.mxu0 %v3293_v28  ;;  %860 = vmatpush.msrb.mxu1 %v3294_v29 }
 0x11c   :  { %880 = vmatpush.msrb.mxu2 %v3295_v30  ;;  %900 = vmatpush.msrb.mxu3 %v3296_v31 }
 0x11d   :  { %841 = vmatpush.msra.mxu0 %v3297_v32  ;;  %861 = vmatpush.msrb.mxu1 %v3298_v33 }
 0x11e   :  { %881 = vmatpush.msrb.mxu2 %v3299_v34  ;;  %901 = vmatpush.msrb.mxu3 %v3300_v36 }
 0x11f   :  { %842 = vmatpush.msra.mxu0 %v3301_v37  ;;  %862 = vmatpush.msrb.mxu1 %v3302_v38 }
 0x120   :  { %882 = vmatpush.msrb.mxu2 %v3303_v39  ;;  %902 = vmatpush.msrb.mxu3 %v3304_v40 }
 0x121   :  { %843 = vmatpush.msra.mxu0 %v3305_v41  ;;  %863 = vmatpush.msrb.mxu1 %v3306_v42 }
 0x122   :  { %883 = vmatpush.msrb.mxu2 %v3307_v43  ;;  %903 = vmatpush.msrb.mxu3 %v3308_v44 }
 0x123   :  { %844 = vmatpush.msra.mxu0 %v3309_v45  ;;  %864 = vmatpush.msrb.mxu1 %v3310_v46 }
 0x124   :  { %884 = vmatpush.msrb.mxu2 %v3311_v47  ;;  %904 = vmatpush.msrb.mxu3 %v3312_v49 }
 0x180   :  { %v544_v50 = vpop.f32.mrf.mxu0  ;;  %v564_v51 = vpop.f32.mrf.mxu1 }
 0x181   :  { %v607_v53 = vadd.f32 %v544_v50, %v3313_v52  ;;  %v608_v55 = vadd.f32 %v564_v51, %v3314_v54 }
 0x183   :  { %v1702_v56 = vmul.f32 -1.442695, %v607_v53  ;;  %v1703_v58 = vmul.f32 -1.442695, %v608_v55 }
 0x185   :  { %1757 = vpow2.f32 %v1702_v56 }
 0x186   :  { %1759 = vpow2.f32 %v1703_v58 }
 0x187   :  { %v604_v59 = vpop.f32.mrf.mxu3  ;;  %v584_v13 = vpop.f32.mrf.mxu2 }
 0x188   :  { %v610_v62 = vadd.f32 %v604_v59, %v3315_v60  ;;  %v609_v35 = vadd.f32 %v584_v13, %v3316_v20  ;;  %v2638_v59 = vld [vmem:[#allocation3 + $0x1e8] sm:$0xff]  ;;  %v2641_v60 = vld [vmem:[#allocation3 + $0x1f0] sm:$0xff] }
 0x189   :  { %v2662_v13 = vld [vmem:[#allocation3 + $0x1a8] sm:$0xff] }
 0x18a   :  { %v1704_v3 = vmul.f32 -1.442695, %v610_v62  ;;  %v2644_v62 = vld [vmem:[#allocation3 + $0x1f8] sm:$0xff]  ;;  %v2674_v20 = vld [vmem:[#allocation3 + $0x188] sm:$0xff] }
 0x18b   :  { %v1758_v10 = vpop.eup %1757 }
 0x18c   :  { %v1760_v5 = vpop.eup %1759  ;;  %v614_v22 = vadd.f32 1.0, %v1758_v10  ;;  %1761 = vpow2.f32 %v1704_v3  ;;  %v2647_v3 = vld [vmem:[#allocation3 + $0x1c0] sm:$0xff]  ;;  %v2650_v10 = vld [vmem:[#allocation3 + $0x1c8] sm:$0xff] }
 0x18d   :  { %v633_v48 = vadd.f32 1.0, %v1760_v5  ;;  %v2653_v5 = vld [vmem:[#allocation3 + $0x1d0] sm:$0xff] }
 0x18e   :  { %1763 = vrcp.f32 %v614_v22  ;;  %v626_v63 = vand.u32 2147483648, %v614_v22  ;;  %v624_v23 = vand.u32 2147483647, %v614_v22  ;;  %vm620_vm0 = vweird.f32 %v614_v22 }
 0x18f   :  { %1765 = vrcp.f32 %v633_v48  ;;  %v645_v21 = vand.u32 2147483648, %v633_v48  ;;  %v643_v61 = vand.u32 2147483647, %v633_v48  ;;  %vm639_vm1 = vweird.f32 %v633_v48 }
 0x190   :  { %v627_v2 = vor.u32 1.1754944e-38, %v626_v63  ;;  %vm625_vm4 = vcmp.eq.f32.partialorder %v624_v23, 8.507059e+37  ;;  %v2695_v63 = vld [vmem:[#allocation3 + $0x140] sm:$0xff]  ;;  %v2704_v23 = vld [vmem:[#allocation3 + $0x158] sm:$0xff] }
 0x191   :  { %v646_v24 = vor.u32 1.1754944e-38, %v645_v21  ;;  %vm644_vm5 = vcmp.eq.f32.partialorder %v643_v61, 8.507059e+37  ;;  %v2698_v21 = vld [vmem:[#allocation3 + $0x148] sm:$0xff] }
 0x192   :  { %v1762_v8 = vpop.eup %1761  ;;  %v2710_v61 = vld [vmem:[#allocation3 + $0x128] sm:$0xff] }
 0x193   :  { %v653_v7 = vadd.f32 1.0, %v1762_v8  ;;  %v2665_v8 = vld [vmem:[#allocation3 + $0x1b0] sm:$0xff] }
 0x194   :  { %v1764_v12 = vpop.eup %1763 }
 0x195   :  { %v1766_v14 = vpop.eup %1765  ;;  %v616_v18 = vmul.f32 %v1764_v12, %v614_v22  ;;  %1767 = vrcp.f32 %v653_v7  ;;  %vm621_vm14 = vweird.f32 %v1764_v12  ;;  %v665_v51 = vand.u32 2147483648, %v653_v7  ;;  %v2656_v22 = vld [vmem:[#allocation3 + $0x1d8] sm:$0xff] }
 0x196   :  { %v635_v57 = vmul.f32 %v1766_v14, %v633_v48  ;;  %1769 = vtanh.f32 %v609_v35  ;;  %vm640_vm15 = vweird.f32 %v1766_v14  ;;  %vm622_vm2 = vmor %vm620_vm0, %vm621_vm14  ;;  %vm659_vm7 = vweird.f32 %v653_v7  ;;  %v2659_v48 = vld [vmem:[#allocation3 + $0x1a0] sm:$0xff]  ;;  %v2677_v35 = vld [vmem:[#allocation3 + $0x190] sm:$0xff] }
 0x197   :  { %v617_v0 = vsub.f32 1.0, %v616_v18  ;;  %vm641_vm3 = vmor %vm639_vm1, %vm640_vm15  ;;  %v663_v52 = vand.u32 2147483647, %v653_v7  ;;  %v666_v54 = vor.u32 1.1754944e-38, %v665_v51  ;;  %v2683_v18 = vld [vmem:[#allocation3 + $0x160] sm:$0xff] }
 0x198   :  { %v636_v9 = vsub.f32 1.0, %v635_v57  ;;  %v2686_v57 = vld [vmem:[#allocation3 + $0x168] sm:$0xff]  ;;  %v2763_v51 = vld [vmem:[#allocation3 + $0x80] sm:$0xff] }
 0x199   :  { %v618_v17 = vmul.f32 %v1764_v12, %v617_v0  ;;  %vm664_vm9 = vcmp.eq.f32.partialorder %v663_v52, 8.507059e+37  ;;  %v2689_v0 = vld [vmem:[#allocation3 + $0x170] sm:$0xff]  ;;  %3321 = vst [vmem:[#allocation23_spill] sm:$0xff] %v2763_v51  ;;  %v2770_v52 = vld [vmem:[#allocation3 + $0x98] sm:$0xff] }
 0x19a   :  { %v637_v11 = vmul.f32 %v1766_v14, %v636_v9  ;;  %v2692_v9 = vld [vmem:[#allocation3 + $0x178] sm:$0xff]  ;;  %3323 = vst [vmem:[#allocation11_spill] sm:$0xff] %v2770_v52 }
 0x19b   :  { %v1768_v6 = vpop.eup %1767  ;;  %v619_v4 = vadd.f32 %v1764_v12, %v618_v17  ;;  %v2701_v17 = vld [vmem:[#allocation3 + $0x150] sm:$0xff] }
 0x19c   :  { %v638_v16 = vadd.f32 %v1766_v14, %v637_v11  ;;  %v655_v19 = vmul.f32 %v1768_v6, %v653_v7  ;;  %v1770_v27 = vpop.eup %1769  ;;  %vm660_vm6 = vweird.f32 %v1768_v6  ;;  %v2668_v7 = vld [vmem:[#allocation3 + $0x1b8] sm:$0xff]  ;;  %v2707_v11 = vld [vmem:[#allocation3 + $0x120] sm:$0xff] }
 0x19d   :  { %v623_v25 = vsel %vm622_vm2, %v1764_v12, %v619_v4  ;;  %vm661_vm8 = vmor %vm659_vm7, %vm660_vm6  ;;  %v2671_v12 = vld [vmem:[#allocation3 + $0x180] sm:$0xff]  ;;  %v2716_v4 = vld [vmem:[#allocation3 + $0x138] sm:$0xff] }
 0x19e   :  { %v628_v28 = vsel %vm625_vm4, %v627_v2, %v623_v25  ;;  %v642_v29 = vsel %vm641_vm3, %v1766_v14, %v638_v16  ;;  %v656_v31 = vsub.f32 1.0, %v655_v19  ;;  %v2680_v14 = vld [vmem:[#allocation3 + $0x198] sm:$0xff]  ;;  %v2719_v2 = vld [vmem:[#allocation3 + $0x100] sm:$0xff]  ;;  %v2722_v16 = vld [vmem:[#allocation3 + $0x108] sm:$0xff] }
 0x19f   :  { %v647_v32 = vsel %vm644_vm5, %v646_v24, %v642_v29  ;;  %v670_v33 = vmul.f32 %v1770_v27, %v628_v28  ;;  %v2725_v19 = vld [vmem:[#allocation3 + $0x110] sm:$0xff]  ;;  %v2728_v24 = vld [vmem:[#allocation3 + $0x118] sm:$0xff]  ;;  %v2731_v25 = vld [vmem:[#allocation3 + $0xe0] sm:$0xff] }
 0x1a0   :  { %v669_v37 = vmul.f32 %v647_v32, %v2560_v1  ;;  %v657_v41 = vmul.f32 %v1768_v6, %v656_v31  ;;  %v2635_v1 = vld [vmem:[#allocation3 + $0x1e0] sm:$0xff]  ;;  %v2734_v27 = vld [vmem:[#allocation3 + $0xe8] sm:$0xff]  ;;  %v2737_v28 = vld [vmem:[#allocation3 + $0xf0] sm:$0xff] }
 0x1a1   :  { %v2740_v29 = vld [vmem:[#allocation3 + $0xf8] sm:$0xff]  ;;  %v2743_v31 = vld [vmem:[#allocation3 + $0xc0] sm:$0xff]  ;;  %v2746_v32 = vld [vmem:[#allocation3 + $0xc8] sm:$0xff] }
 0x1a2   :  { %v2632_v45 = vadd.f32 %v670_v33, %v669_v37  ;;  %v658_v50 = vadd.f32 %v1768_v6, %v657_v41  ;;  %v2750_v33 = vld [vmem:[#allocation3 + $0xd8] sm:$0xff]  ;;  %v2753_v37 = vld [vmem:[#allocation3 + $0xa0] sm:$0xff]  ;;  %v2756_v41 = vld [vmem:[#allocation3 + $0xa8] sm:$0xff] }
 0x1a3   :  { %3317 = vst [vmem:[#allocation19_spill] sm:$0xff] %v2750_v33 }
 0x1a4   :  { %1771 = vtanh.f32 %v2632_v45  ;;  %v662_v53 = vsel %vm661_vm8, %v1768_v6, %v658_v50  ;;  %v2713_v6 = vld [vmem:[#allocation3 + $0x130] sm:$0xff]  ;;  %3318 = vst [vmem:[#allocation14_spill] sm:$0xff] %v2753_v37  ;;  %v2760_v50 = vld [vmem:[#allocation3 + $0xb8] sm:$0xff] }
 0x1a5   :  { %v667_v56 = vsel %vm664_vm9, %v666_v54, %v662_v53  ;;  %3319 = vst [vmem:[#allocation10_spill] sm:$0xff] %v2756_v41  ;;  %v2773_v53 = vld [vmem:[#allocation3 + $0x60] sm:$0xff] }
 0x1a6   :  { %3320 = vst [vmem:[#allocation13_spill] sm:$0xff] %v2760_v50  ;;  %v2781_v54 = vld [vmem:[#allocation3 + $0x40] sm:$0xff] }
 0x1a7   :  { %3324 = vst [vmem:[#allocation16_spill] sm:$0xff] %v2773_v53 }
 0x1a8   :  { %3326 = vst [vmem:[#allocation21_spill] sm:$0xff] %v2781_v54 }
 0x1aa   :  { %v1772_v55 = vpop.eup %1771 }
 0x1ab   :  { %v673_v58 = vmul.f32 %v1772_v55, %v667_v56  ;;  %v3330_v55 = vld [vmem:[#allocation44_spill] sm:$0xff] }
 0x1ad   :  { %694 = vmatmul.f32.vlgmr.msrb.gmra.mxu0 %v673_v58  ;;  %714 = vmatmul.f32.vlgmr.msra.gmra.mxu1 %v673_v58 }
 0x1ae   :  { %734 = vmatmul.f32.vlgmr.msra.gmra.mxu2 %v673_v58  ;;  %754 = vmatmul.f32.vlgmr.msra.gmra.mxu3 %v673_v58  ;;  %v3331_v58 = vld [vmem:[#allocation46_spill] sm:$0xff] }
 0x1af   :  { %980 = vmatpush.msrb.mxu0 %v2635_v1  ;;  %1000 = vmatpush.msra.mxu1 %v2638_v59 }
 0x1b0   :  { %1020 = vmatpush.msra.mxu2 %v2641_v60  ;;  %1040 = vmatpush.msra.mxu3 %v2644_v62 }
 0x1b1   :  { %981 = vmatpush.msrb.mxu0 %v2647_v3  ;;  %1001 = vmatpush.msra.mxu1 %v2650_v10 }
 0x1b2   :  { %1021 = vmatpush.msra.mxu2 %v2653_v5  ;;  %1041 = vmatpush.msra.mxu3 %v2656_v22 }
 0x1b3   :  { %982 = vmatpush.msrb.mxu0 %v2659_v48  ;;  %1002 = vmatpush.msra.mxu1 %v2662_v13 }
 0x1b4   :  { %1022 = vmatpush.msra.mxu2 %v2665_v8  ;;  %1042 = vmatpush.msra.mxu3 %v2668_v7 }
 0x1b5   :  { %983 = vmatpush.msrb.mxu0 %v2671_v12  ;;  %1003 = vmatpush.msra.mxu1 %v2674_v20 }
 0x1b6   :  { %1023 = vmatpush.msra.mxu2 %v2677_v35  ;;  %1043 = vmatpush.msra.mxu3 %v2680_v14 }
 0x1b7   :  { %984 = vmatpush.msrb.mxu0 %v2683_v18  ;;  %1004 = vmatpush.msra.mxu1 %v2686_v57 }
 0x1b8   :  { %1024 = vmatpush.msra.mxu2 %v2689_v0  ;;  %1044 = vmatpush.msra.mxu3 %v2692_v9 }
 0x1b9   :  { %985 = vmatpush.msrb.mxu0 %v2695_v63  ;;  %1005 = vmatpush.msra.mxu1 %v2698_v21 }
 0x1ba   :  { %1025 = vmatpush.msra.mxu2 %v2701_v17  ;;  %1045 = vmatpush.msra.mxu3 %v2704_v23 }
 0x1bb   :  { %986 = vmatpush.msrb.mxu0 %v2707_v11  ;;  %1006 = vmatpush.msra.mxu1 %v2710_v61 }
 0x1bc   :  { %1026 = vmatpush.msra.mxu2 %v2713_v6  ;;  %1046 = vmatpush.msra.mxu3 %v2716_v4 }
 0x1bd   :  { %987 = vmatpush.msrb.mxu0 %v2719_v2  ;;  %1007 = vmatpush.msra.mxu1 %v2722_v16 }
 0x1be   :  { %1027 = vmatpush.msra.mxu2 %v2725_v19  ;;  %1047 = vmatpush.msra.mxu3 %v2728_v24 }
 0x1bf   :  { %988 = vmatpush.msrb.mxu0 %v2731_v25  ;;  %1008 = vmatpush.msra.mxu1 %v2734_v27 }
 0x1c0   :  { %1028 = vmatpush.msra.mxu2 %v2737_v28  ;;  %1048 = vmatpush.msra.mxu3 %v2740_v29 }
 0x1c1   :  { %989 = vmatpush.msrb.mxu0 %v2743_v31  ;;  %1009 = vmatpush.msra.mxu1 %v2746_v32 }
 0x1c2   :  { %1029 = vmatpush.msra.mxu2 %v3287_v15  ;;  %1049 = vmatpush.msra.mxu3 %v2750_v33  ;;  %v2766_v15 = vld [vmem:[#allocation3 + $0x88] sm:$0xff] }
 0x1c3   :  { %990 = vmatpush.msrb.mxu0 %v2753_v37  ;;  %1010 = vmatpush.msra.mxu1 %v2756_v41  ;;  %3322 = vst [vmem:[#allocation17_spill] sm:$0xff] %v2766_v15 }
 0x1c4   :  { %1030 = vmatpush.msra.mxu2 %v3291_v26  ;;  %1050 = vmatpush.msra.mxu3 %v2760_v50  ;;  %v2776_v26 = vld [vmem:[#allocation3 + $0x68] sm:$0xff] }
 0x1c5   :  { %991 = vmatpush.msrb.mxu0 %v2763_v51  ;;  %1011 = vmatpush.msra.mxu1 %v2766_v15  ;;  %3325 = vst [vmem:[#allocation26_spill] sm:$0xff] %v2776_v26 }
 0x1c6   :  { %1031 = vmatpush.msra.mxu2 %v3295_v30  ;;  %1051 = vmatpush.msra.mxu3 %v2770_v52  ;;  %v2787_v30 = vld [vmem:[#allocation3 + $0x20] sm:$0xff] }
 0x1c7   :  { %992 = vmatpush.msrb.mxu0 %v2773_v53  ;;  %1012 = vmatpush.msra.mxu1 %v2776_v26  ;;  %3327 = vst [vmem:[#allocation12_spill] sm:$0xff] %v2787_v30 }
 0x1c8   :  { %1032 = vmatpush.msra.mxu2 %v3299_v34  ;;  %1052 = vmatpush.msra.mxu3 %v3300_v36  ;;  %v2793_v34 = vld [vmem:[#allocation3] sm:$0xff] }
 0x1c9   :  { %993 = vmatpush.msrb.mxu0 %v2781_v54  ;;  %1013 = vmatpush.msra.mxu1 %v3302_v38  ;;  %3328 = vst [vmem:[#allocation20_spill] sm:$0xff] %v2793_v34 }
 0x1ca   :  { %1033 = vmatpush.msra.mxu2 %v3303_v39  ;;  %1053 = vmatpush.msra.mxu3 %v3304_v40  ;;  %v3329_v39 = vld [vmem:[#allocation39_spill] sm:$0xff] }
 0x1cb   :  { %994 = vmatpush.msrb.mxu0 %v2787_v30  ;;  %1014 = vmatpush.msra.mxu1 %v3306_v42 }
 0x1cc   :  { %1034 = vmatpush.msra.mxu2 %v3307_v43  ;;  %1054 = vmatpush.msra.mxu3 %v3308_v44 }
 0x1cd   :  { %995 = vmatpush.msrb.mxu0 %v2793_v34  ;;  %1015 = vmatpush.msra.mxu1 %v3310_v46 }
 0x1ce   :  { %1035 = vmatpush.msra.mxu2 %v3311_v47  ;;  %1055 = vmatpush.msra.mxu3 %v3312_v49 }
 0x22a   :  { %v695_v36 = vpop.f32.mrf.mxu0  ;;  %v715_v38 = vpop.f32.mrf.mxu1 }
 0x22b   :  { %v758_v40 = vadd.f32 %v695_v36, %v3329_v39  ;;  %v759_v42 = vadd.f32 %v715_v38, %v3330_v55  ;;  %v3332_v38 = vld [vmem:[#allocation45_spill] sm:$0xff] }
 0x22d   :  { %v1705_v56 = vmul.f32 -1.442695, %v758_v40  ;;  %v1706_v43 = vmul.f32 -1.442695, %v759_v42 }
 0x22f   :  { %1773 = vpow2.f32 %v1705_v56 }
 0x230   :  { %1775 = vpow2.f32 %v1706_v43 }
 0x231   :  { %v755_v44 = vpop.f32.mrf.mxu3  ;;  %v735_v49 = vpop.f32.mrf.mxu2 }
 0x232   :  { %v761_v30 = vadd.f32 %v755_v44, %v3331_v58  ;;  %v760_v40 = vadd.f32 %v735_v49, %v3332_v38 }
 0x234   :  { %v1707_v34 = vmul.f32 -1.442695, %v761_v30 }
 0x235   :  { %v1774_v54 = vpop.eup %1773 }
 0x236   :  { %v1776_v46 = vpop.eup %1775  ;;  %v765_v26 = vadd.f32 1.0, %v1774_v54  ;;  %1777 = vpow2.f32 %v1707_v34 }
 0x237   :  { %v784_v47 = vadd.f32 1.0, %v1776_v46 }
 0x238   :  { %1779 = vrcp.f32 %v765_v26  ;;  %v777_v30 = vand.u32 2147483648, %v765_v26  ;;  %v775_v34 = vand.u32 2147483647, %v765_v26  ;;  %vm771_vm12 = vweird.f32 %v765_v26 }
 0x239   :  { %1781 = vrcp.f32 %v784_v47  ;;  %v796_v58 = vand.u32 2147483648, %v784_v47  ;;  %v794_v52 = vand.u32 2147483647, %v784_v47  ;;  %vm790_vm13 = vweird.f32 %v784_v47 }
 0x23a   :  { %v778_v49 = vor.u32 1.1754944e-38, %v777_v30  ;;  %vm776_vm0 = vcmp.eq.f32.partialorder %v775_v34, 8.507059e+37 }
 0x23b   :  { %vm795_vm1 = vcmp.eq.f32.partialorder %v794_v52, 8.507059e+37 }
 0x23c   :  { %v1778_v53 = vpop.eup %1777 }
 0x23d   :  { %v804_v36 = vadd.f32 1.0, %v1778_v53 }
 0x23e   :  { %v1780_v39 = vpop.eup %1779 }
 0x23f   :  { %v1782_v55 = vpop.eup %1781  ;;  %v767_v42 = vmul.f32 %v1780_v39, %v765_v26  ;;  %1783 = vrcp.f32 %v804_v36  ;;  %vm772_vm10 = vweird.f32 %v1780_v39  ;;  %v816_v30 = vand.u32 2147483648, %v804_v36 }
 0x240   :  { %v786_v56 = vmul.f32 %v1782_v55, %v784_v47  ;;  %1785 = vtanh.f32 %v760_v40  ;;  %vm791_vm11 = vweird.f32 %v1782_v55  ;;  %vm773_vm14 = vmor %vm771_vm12, %vm772_vm10  ;;  %vm810_vm3 = vweird.f32 %v804_v36 }
 0x241   :  { %v768_v43 = vsub.f32 1.0, %v767_v42  ;;  %vm792_vm15 = vmor %vm790_vm13, %vm791_vm11  ;;  %v797_v42 = vor.u32 1.1754944e-38, %v796_v58  ;;  %v817_v34 = vor.u32 1.1754944e-38, %v816_v30  ;;  %v3351_v30 = vld [vmem:[#allocation12_spill] sm:$0xff] }
 0x242   :  { %v787_v44 = vsub.f32 1.0, %v786_v56 }
 0x243   :  { %v769_v54 = vmul.f32 %v1780_v39, %v768_v43 }
 0x244   :  { %v788_v46 = vmul.f32 %v1782_v55, %v787_v44 }
 0x245   :  { %v1784_v15 = vpop.eup %1783  ;;  %v770_v53 = vadd.f32 %v1780_v39, %v769_v54 }
 0x246   :  { %v789_v38 = vadd.f32 %v1782_v55, %v788_v46  ;;  %v806_v51 = vmul.f32 %v1784_v15, %v804_v36  ;;  %v1786_v40 = vpop.eup %1785  ;;  %vm811_vm2 = vweird.f32 %v1784_v15  ;;  %v3340_v46 = vld [vmem:[#allocation17_spill] sm:$0xff] }
 0x247   :  { %v774_v56 = vsel %vm773_vm14, %v1780_v39, %v770_v53  ;;  %v814_v39 = vand.u32 2147483647, %v804_v36  ;;  %vm812_vm4 = vmor %vm810_vm3, %vm811_vm2  ;;  %v3339_v36 = vld [vmem:[#allocation23_spill] sm:$0xff]  ;;  %v2857_v53 = vld [vmem:[#allocation3 + $0x90] sm:$0xff] }
 0x248   :  { %v779_v50 = vsel %vm776_vm0, %v778_v49, %v774_v56  ;;  %v793_v43 = vsel %vm792_vm15, %v1782_v55, %v789_v38  ;;  %v807_v41 = vsub.f32 1.0, %v806_v51  ;;  %3341 = vst [vmem:[#allocation15_spill] sm:$0xff] %v2857_v53  ;;  %v3342_v49 = vld [vmem:[#allocation11_spill] sm:$0xff]  ;;  %v3343_v38 = vld [vmem:[#allocation16_spill] sm:$0xff]  ;;  %v2863_v56 = vld [vmem:[#allocation3 + $0x70] sm:$0xff] }
 0x249   :  { %v798_v44 = vsel %vm795_vm1, %v797_v42, %v793_v43  ;;  %v821_v37 = vmul.f32 %v1786_v40, %v779_v50  ;;  %vm815_vm5 = vcmp.eq.f32.partialorder %v814_v39, 8.507059e+37  ;;  %v2851_v50 = vld [vmem:[#allocation3 + $0xb0] sm:$0xff]  ;;  %3345 = vst [vmem:[#allocation24_spill] sm:$0xff] %v2863_v56  ;;  %v2866_v40 = vld [vmem:[#allocation3 + $0x78] sm:$0xff]  ;;  %v3347_v43 = vld [vmem:[#allocation21_spill] sm:$0xff] }
 0x24a   :  { %v820_v33 = vmul.f32 %v798_v44, %v2632_v45  ;;  %v808_v54 = vmul.f32 %v1784_v15, %v807_v41  ;;  %v2845_v45 = vld [vmem:[#allocation3 + $0xd0] sm:$0xff]  ;;  %3337 = vst [vmem:[#allocation25_spill] sm:$0xff] %v2851_v50  ;;  %v2870_v44 = vld [vmem:[#allocation3 + $0x48] sm:$0xff] }
 0x24b   :  { %3333 = vst [vmem:[#allocation29_spill] sm:$0xff] %v2845_v45  ;;  %v3336_v41 = vld [vmem:[#allocation10_spill] sm:$0xff]  ;;  %v2880_v39 = vld [vmem:[#allocation3 + $0x28] sm:$0xff] }
 0x24c   :  { %v2804_v26 = vadd.f32 %v821_v37, %v820_v33  ;;  %v809_v47 = vadd.f32 %v1784_v15, %v808_v54  ;;  %v3334_v33 = vld [vmem:[#allocation19_spill] sm:$0xff]  ;;  %v3335_v37 = vld [vmem:[#allocation14_spill] sm:$0xff]  ;;  %3346 = vst [vmem:[#allocation32_spill] sm:$0xff] %v2866_v40 }
 0x24d   :  { %v3344_v42 = vld [vmem:[#allocation26_spill] sm:$0xff]  ;;  %3348 = vst [vmem:[#allocation28_spill] sm:$0xff] %v2870_v44 }
 0x24e   :  { %1787 = vtanh.f32 %v2804_v26  ;;  %v813_v58 = vsel %vm812_vm4, %v1784_v15, %v809_v47  ;;  %v3338_v15 = vld [vmem:[#allocation13_spill] sm:$0xff]  ;;  %v2873_v54 = vld [vmem:[#allocation3 + $0x50] sm:$0xff]  ;;  %v2876_v47 = vld [vmem:[#allocation3 + $0x58] sm:$0xff]  ;;  %3352 = vst [vmem:[#allocation33_spill] sm:$0xff] %v2880_v39 }
 0x24f   :  { %v818_v51 = vsel %vm815_vm5, %v817_v34, %v813_v58  ;;  %3349 = vst [vmem:[#allocation18_spill] sm:$0xff] %v2873_v54  ;;  %v2883_v58 = vld [vmem:[#allocation3 + $0x30] sm:$0xff]  ;;  %v2886_v34 = vld [vmem:[#allocation3 + $0x38] sm:$0xff] }
 0x250   :  { %3350 = vst [vmem:[#allocation27_spill] sm:$0xff] %v2876_v47 }
 0x251   :  { %3353 = vst [vmem:[#allocation31_spill] sm:$0xff] %v2883_v58 }
 0x252   :  { %3354 = vst [vmem:[#allocation22_spill] sm:$0xff] %v2886_v34 }
 0x254   :  { %v1788_v52 = vpop.eup %1787 }
 0x255   :  { %v824_v55 = vmul.f32 %v1788_v52, %v818_v51  ;;  %v3355_v52 = vld [vmem:[#allocation20_spill] sm:$0xff]  ;;  %v2890_v51 = vld [vmem:[#allocation3 + $0x8] sm:$0xff] }
 0x256   :  { %3356 = vst [vmem:[#allocation30_spill] sm:$0xff] %v2890_v51 }
 0x257   :  { %845 = vmatmul.f32.vlgmr.msra.gmra.mxu0 %v824_v55  ;;  %865 = vmatmul.f32.vlgmr.msrb.gmra.mxu1 %v824_v55 }
 0x258   :  { %885 = vmatmul.f32.vlgmr.msrb.gmra.mxu2 %v824_v55  ;;  %905 = vmatmul.f32.vlgmr.msrb.gmra.mxu3 %v824_v55  ;;  %v2893_v55 = vld [vmem:[#allocation3 + $0x10] sm:$0xff] }
 0x259   :  { %1131 = vmatpush.msra.mxu0 %v2635_v1  ;;  %1151 = vmatpush.msrb.mxu1 %v2638_v59  ;;  %3357 = vst [vmem:[#allocation35_spill] sm:$0xff] %v2893_v55 }
 0x25a   :  { %1171 = vmatpush.msrb.mxu2 %v2641_v60  ;;  %1191 = vmatpush.msrb.mxu3 %v2644_v62 }
 0x25b   :  { %1132 = vmatpush.msra.mxu0 %v2647_v3  ;;  %1152 = vmatpush.msrb.mxu1 %v2650_v10 }
 0x25c   :  { %1172 = vmatpush.msrb.mxu2 %v2653_v5  ;;  %1192 = vmatpush.msrb.mxu3 %v2656_v22 }
 0x25d   :  { %1133 = vmatpush.msra.mxu0 %v2659_v48  ;;  %1153 = vmatpush.msrb.mxu1 %v2662_v13 }
 0x25e   :  { %1173 = vmatpush.msrb.mxu2 %v2665_v8  ;;  %1193 = vmatpush.msrb.mxu3 %v2668_v7 }
 0x25f   :  { %1134 = vmatpush.msra.mxu0 %v2671_v12  ;;  %1154 = vmatpush.msrb.mxu1 %v2674_v20 }
 0x260   :  { %1174 = vmatpush.msrb.mxu2 %v2677_v35  ;;  %1194 = vmatpush.msrb.mxu3 %v2680_v14 }
 0x261   :  { %1135 = vmatpush.msra.mxu0 %v2683_v18  ;;  %1155 = vmatpush.msrb.mxu1 %v2686_v57 }
 0x262   :  { %1175 = vmatpush.msrb.mxu2 %v2689_v0  ;;  %1195 = vmatpush.msrb.mxu3 %v2692_v9 }
 0x263   :  { %1136 = vmatpush.msra.mxu0 %v2695_v63  ;;  %1156 = vmatpush.msrb.mxu1 %v2698_v21 }
 0x264   :  { %1176 = vmatpush.msrb.mxu2 %v2701_v17  ;;  %1196 = vmatpush.msrb.mxu3 %v2704_v23 }
 0x265   :  { %1137 = vmatpush.msra.mxu0 %v2707_v11  ;;  %1157 = vmatpush.msrb.mxu1 %v2710_v61 }
 0x266   :  { %1177 = vmatpush.msrb.mxu2 %v2713_v6  ;;  %1197 = vmatpush.msrb.mxu3 %v2716_v4 }
 0x267   :  { %1138 = vmatpush.msra.mxu0 %v2719_v2  ;;  %1158 = vmatpush.msrb.mxu1 %v2722_v16 }
 0x268   :  { %1178 = vmatpush.msrb.mxu2 %v2725_v19  ;;  %1198 = vmatpush.msrb.mxu3 %v2728_v24 }
 0x269   :  { %1139 = vmatpush.msra.mxu0 %v2731_v25  ;;  %1159 = vmatpush.msrb.mxu1 %v2734_v27 }
 0x26a   :  { %1179 = vmatpush.msrb.mxu2 %v2737_v28  ;;  %1199 = vmatpush.msrb.mxu3 %v2740_v29 }
 0x26b   :  { %1140 = vmatpush.msra.mxu0 %v2743_v31  ;;  %1160 = vmatpush.msrb.mxu1 %v2746_v32 }
 0x26c   :  { %1180 = vmatpush.msrb.mxu2 %v2845_v45  ;;  %1200 = vmatpush.msrb.mxu3 %v3334_v33 }
 0x26d   :  { %1141 = vmatpush.msra.mxu0 %v3335_v37  ;;  %1161 = vmatpush.msrb.mxu1 %v3336_v41 }
 0x26e   :  { %1181 = vmatpush.msrb.mxu2 %v2851_v50  ;;  %1201 = vmatpush.msrb.mxu3 %v3338_v15 }
 0x26f   :  { %1142 = vmatpush.msra.mxu0 %v3339_v36  ;;  %1162 = vmatpush.msrb.mxu1 %v3340_v46 }
 0x270   :  { %1182 = vmatpush.msrb.mxu2 %v2857_v53  ;;  %1202 = vmatpush.msrb.mxu3 %v3342_v49 }
 0x271   :  { %1143 = vmatpush.msra.mxu0 %v3343_v38  ;;  %1163 = vmatpush.msrb.mxu1 %v3344_v42 }
 0x272   :  { %1183 = vmatpush.msrb.mxu2 %v2863_v56  ;;  %1203 = vmatpush.msrb.mxu3 %v2866_v40 }
 0x273   :  { %1144 = vmatpush.msra.mxu0 %v3347_v43  ;;  %1164 = vmatpush.msrb.mxu1 %v2870_v44  ;;  %v3360_v44 = vld [vmem:[#allocation48_spill] sm:$0xff] }
 0x274   :  { %1184 = vmatpush.msrb.mxu2 %v2873_v54  ;;  %1204 = vmatpush.msrb.mxu3 %v2876_v47  ;;  %v3359_v47 = vld [vmem:[#allocation43_spill] sm:$0xff] }
 0x275   :  { %1145 = vmatpush.msra.mxu0 %v3351_v30  ;;  %1165 = vmatpush.msrb.mxu1 %v2880_v39  ;;  %v2896_v30 = vld [vmem:[#allocation3 + $0x18] sm:$0xff] }
 0x276   :  { %1185 = vmatpush.msrb.mxu2 %v2883_v58  ;;  %1205 = vmatpush.msrb.mxu3 %v2886_v34  ;;  %3358 = vst [vmem:[#allocation34_spill] sm:$0xff] %v2896_v30 }
 0x277   :  { %1146 = vmatpush.msra.mxu0 %v3355_v52  ;;  %1166 = vmatpush.msrb.mxu1 %v2890_v51  ;;  %v3361_v51 = vld [vmem:[#allocation50_spill] sm:$0xff] }
 0x278   :  { %1186 = vmatpush.msrb.mxu2 %v2893_v55  ;;  %1206 = vmatpush.msrb.mxu3 %v2896_v30 }
 0x2d4   :  { %v846_v39 = vpop.f32.mrf.mxu0  ;;  %v866_v58 = vpop.f32.mrf.mxu1 }
 0x2d5   :  { %v909_v54 = vadd.f32 %v846_v39, %v3359_v47  ;;  %v910_v34 = vadd.f32 %v866_v58, %v3360_v44  ;;  %v3362_v44 = vld [vmem:[#allocation49_spill] sm:$0xff] }
 0x2d7   :  { %v1708_v43 = vmul.f32 -1.442695, %v909_v54  ;;  %v1709_v52 = vmul.f32 -1.442695, %v910_v34 }
 0x2d9   :  { %1789 = vpow2.f32 %v1708_v43 }
 0x2da   :  { %1791 = vpow2.f32 %v1709_v52 }
 0x2db   :  { %v906_v40 = vpop.f32.mrf.mxu3  ;;  %v886_v30 = vpop.f32.mrf.mxu2 }
 0x2dc   :  { %v912_v56 = vadd.f32 %v906_v40, %v3361_v51  ;;  %v911_v54 = vadd.f32 %v886_v30, %v3362_v44 }
 0x2de   :  { %v1710_v42 = vmul.f32 -1.442695, %v912_v56 }
 0x2df   :  { %v1790_v38 = vpop.eup %1789 }
 0x2e0   :  { %v1792_v55 = vpop.eup %1791  ;;  %v916_v49 = vadd.f32 1.0, %v1790_v38  ;;  %1793 = vpow2.f32 %v1710_v42 }
 0x2e1   :  { %v935_v53 = vadd.f32 1.0, %v1792_v55 }
 0x2e2   :  { %1795 = vrcp.f32 %v916_v49  ;;  %v928_v56 = vand.u32 2147483648, %v916_v49  ;;  %v926_v42 = vand.u32 2147483647, %v916_v49  ;;  %vm922_vm8 = vweird.f32 %v916_v49 }
 0x2e3   :  { %1797 = vrcp.f32 %v935_v53  ;;  %v947_v51 = vand.u32 2147483648, %v935_v53  ;;  %v945_v36 = vand.u32 2147483647, %v935_v53  ;;  %vm941_vm9 = vweird.f32 %v935_v53 }
 0x2e4   :  { %v929_v30 = vor.u32 1.1754944e-38, %v928_v56  ;;  %vm927_vm12 = vcmp.eq.f32.partialorder %v926_v42, 8.507059e+37 }
 0x2e5   :  { %vm946_vm13 = vcmp.eq.f32.partialorder %v945_v36, 8.507059e+37 }
 0x2e6   :  { %v1794_v46 = vpop.eup %1793 }
 0x2e7   :  { %v955_v47 = vadd.f32 1.0, %v1794_v46 }
 0x2e8   :  { %v1796_v39 = vpop.eup %1795 }
 0x2e9   :  { %v1798_v58 = vpop.eup %1797  ;;  %v918_v43 = vmul.f32 %v1796_v39, %v916_v49  ;;  %1799 = vrcp.f32 %v955_v47  ;;  %vm923_vm6 = vweird.f32 %v1796_v39  ;;  %v967_v56 = vand.u32 2147483648, %v955_v47 }
 0x2ea   :  { %v937_v34 = vmul.f32 %v1798_v58, %v935_v53  ;;  %1801 = vtanh.f32 %v911_v54  ;;  %vm942_vm7 = vweird.f32 %v1798_v58  ;;  %vm924_vm10 = vmor %vm922_vm8, %vm923_vm6  ;;  %vm961_vm15 = vweird.f32 %v955_v47 }
 0x2eb   :  { %v919_v52 = vsub.f32 1.0, %v918_v43  ;;  %vm943_vm11 = vmor %vm941_vm9, %vm942_vm7  ;;  %v948_v43 = vor.u32 1.1754944e-38, %v947_v51  ;;  %v968_v42 = vor.u32 1.1754944e-38, %v967_v56  ;;  %v3381_v56 = vld [vmem:[#allocation12_spill] sm:$0xff] }
 0x2ec   :  { %v938_v40 = vsub.f32 1.0, %v937_v34 }
 0x2ed   :  { %v920_v38 = vmul.f32 %v1796_v39, %v919_v52 }
 0x2ee   :  { %v939_v55 = vmul.f32 %v1798_v58, %v938_v40 }
 0x2ef   :  { %v1800_v15 = vpop.eup %1799  ;;  %v921_v46 = vadd.f32 %v1796_v39, %v920_v38 }
 0x2f0   :  { %v940_v44 = vadd.f32 %v1798_v58, %v939_v55  ;;  %v957_v50 = vmul.f32 %v1800_v15, %v955_v47  ;;  %v1802_v54 = vpop.eup %1801  ;;  %vm962_vm14 = vweird.f32 %v1800_v15  ;;  %v3370_v55 = vld [vmem:[#allocation17_spill] sm:$0xff] }
 0x2f1   :  { %v925_v34 = vsel %vm924_vm10, %v1796_v39, %v921_v46  ;;  %v965_v39 = vand.u32 2147483647, %v955_v47  ;;  %vm963_vm0 = vmor %vm961_vm15, %vm962_vm14  ;;  %v3369_v47 = vld [vmem:[#allocation23_spill] sm:$0xff] }
 0x2f2   :  { %v930_v41 = vsel %vm927_vm12, %v929_v30, %v925_v34  ;;  %v944_v52 = vsel %vm943_vm11, %v1798_v58, %v940_v44  ;;  %v958_v37 = vsub.f32 1.0, %v957_v50  ;;  %v3371_v46 = vld [vmem:[#allocation15_spill] sm:$0xff]  ;;  %v3373_v44 = vld [vmem:[#allocation16_spill] sm:$0xff] }
 0x2f3   :  { %v949_v40 = vsel %vm946_vm13, %v948_v43, %v944_v52  ;;  %v972_v33 = vmul.f32 %v1802_v54, %v930_v41  ;;  %vm966_vm1 = vcmp.eq.f32.partialorder %v965_v39, 8.507059e+37  ;;  %v3367_v41 = vld [vmem:[#allocation25_spill] sm:$0xff]  ;;  %v3372_v30 = vld [vmem:[#allocation11_spill] sm:$0xff]  ;;  %v3374_v43 = vld [vmem:[#allocation26_spill] sm:$0xff] }
 0x2f4   :  { %v971_v45 = vmul.f32 %v949_v40, %v2804_v26  ;;  %v959_v38 = vmul.f32 %v1800_v15, %v958_v37  ;;  %v3363_v26 = vld [vmem:[#allocation29_spill] sm:$0xff]  ;;  %v3366_v37 = vld [vmem:[#allocation10_spill] sm:$0xff]  ;;  %v3375_v34 = vld [vmem:[#allocation24_spill] sm:$0xff] }
 0x2f5   :  { %v3376_v54 = vld [vmem:[#allocation32_spill] sm:$0xff]  ;;  %v3377_v52 = vld [vmem:[#allocation21_spill] sm:$0xff] }
 0x2f6   :  { %v2904_v49 = vadd.f32 %v972_v33, %v971_v45  ;;  %v960_v53 = vadd.f32 %v1800_v15, %v959_v38  ;;  %v3364_v45 = vld [vmem:[#allocation19_spill] sm:$0xff]  ;;  %v3365_v33 = vld [vmem:[#allocation14_spill] sm:$0xff]  ;;  %v3378_v40 = vld [vmem:[#allocation28_spill] sm:$0xff] }
 0x2f7   :  { %v3379_v38 = vld [vmem:[#allocation18_spill] sm:$0xff]  ;;  %v3382_v39 = vld [vmem:[#allocation33_spill] sm:$0xff] }
 0x2f8   :  { %1803 = vtanh.f32 %v2904_v49  ;;  %v964_v51 = vsel %vm963_vm0, %v1800_v15, %v960_v53  ;;  %v3368_v15 = vld [vmem:[#allocation13_spill] sm:$0xff]  ;;  %v3380_v53 = vld [vmem:[#allocation27_spill] sm:$0xff] }
 0x2f9   :  { %v969_v50 = vsel %vm966_vm1, %v968_v42, %v964_v51  ;;  %v3383_v51 = vld [vmem:[#allocation31_spill] sm:$0xff]  ;;  %v3384_v42 = vld [vmem:[#allocation22_spill] sm:$0xff] }
 0x2fe   :  { %v1804_v36 = vpop.eup %1803 }
 0x2ff   :  { %v975_v58 = vmul.f32 %v1804_v36, %v969_v50  ;;  %v3385_v36 = vld [vmem:[#allocation20_spill] sm:$0xff]  ;;  %v3386_v50 = vld [vmem:[#allocation30_spill] sm:$0xff] }
 0x301   :  { %996 = vmatmul.f32.vlgmr.msrb.gmra.mxu0 %v975_v58  ;;  %1016 = vmatmul.f32.vlgmr.msra.gmra.mxu1 %v975_v58 }
 0x302   :  { %1036 = vmatmul.f32.vlgmr.msra.gmra.mxu2 %v975_v58  ;;  %1056 = vmatmul.f32.vlgmr.msra.gmra.mxu3 %v975_v58  ;;  %v3387_v58 = vld [vmem:[#allocation35_spill] sm:$0xff] }
 0x303   :  { %1282 = vmatpush.msrb.mxu0 %v2635_v1  ;;  %1302 = vmatpush.msra.mxu1 %v2638_v59 }
 0x304   :  { %1322 = vmatpush.msra.mxu2 %v2641_v60  ;;  %1342 = vmatpush.msra.mxu3 %v2644_v62 }
 0x305   :  { %1283 = vmatpush.msrb.mxu0 %v2647_v3  ;;  %1303 = vmatpush.msra.mxu1 %v2650_v10 }
 0x306   :  { %1323 = vmatpush.msra.mxu2 %v2653_v5  ;;  %1343 = vmatpush.msra.mxu3 %v2656_v22 }
 0x307   :  { %1284 = vmatpush.msrb.mxu0 %v2659_v48  ;;  %1304 = vmatpush.msra.mxu1 %v2662_v13 }
 0x308   :  { %1324 = vmatpush.msra.mxu2 %v2665_v8  ;;  %1344 = vmatpush.msra.mxu3 %v2668_v7 }
 0x309   :  { %1285 = vmatpush.msrb.mxu0 %v2671_v12  ;;  %1305 = vmatpush.msra.mxu1 %v2674_v20 }
 0x30a   :  { %1325 = vmatpush.msra.mxu2 %v2677_v35  ;;  %1345 = vmatpush.msra.mxu3 %v2680_v14 }
 0x30b   :  { %1286 = vmatpush.msrb.mxu0 %v2683_v18  ;;  %1306 = vmatpush.msra.mxu1 %v2686_v57 }
 0x30c   :  { %1326 = vmatpush.msra.mxu2 %v2689_v0  ;;  %1346 = vmatpush.msra.mxu3 %v2692_v9 }
 0x30d   :  { %1287 = vmatpush.msrb.mxu0 %v2695_v63  ;;  %1307 = vmatpush.msra.mxu1 %v2698_v21 }
 0x30e   :  { %1327 = vmatpush.msra.mxu2 %v2701_v17  ;;  %1347 = vmatpush.msra.mxu3 %v2704_v23 }
 0x30f   :  { %1288 = vmatpush.msrb.mxu0 %v2707_v11  ;;  %1308 = vmatpush.msra.mxu1 %v2710_v61 }
 0x310   :  { %1328 = vmatpush.msra.mxu2 %v2713_v6  ;;  %1348 = vmatpush.msra.mxu3 %v2716_v4 }
 0x311   :  { %1289 = vmatpush.msrb.mxu0 %v2719_v2  ;;  %1309 = vmatpush.msra.mxu1 %v2722_v16 }
 0x312   :  { %1329 = vmatpush.msra.mxu2 %v2725_v19  ;;  %1349 = vmatpush.msra.mxu3 %v2728_v24 }
 0x313   :  { %1290 = vmatpush.msrb.mxu0 %v2731_v25  ;;  %1310 = vmatpush.msra.mxu1 %v2734_v27 }
 0x314   :  { %1330 = vmatpush.msra.mxu2 %v2737_v28  ;;  %1350 = vmatpush.msra.mxu3 %v2740_v29 }
 0x315   :  { %1291 = vmatpush.msrb.mxu0 %v2743_v31  ;;  %1311 = vmatpush.msra.mxu1 %v2746_v32 }
 0x316   :  { %1331 = vmatpush.msra.mxu2 %v3363_v26  ;;  %1351 = vmatpush.msra.mxu3 %v3364_v45 }
 0x317   :  { %1292 = vmatpush.msrb.mxu0 %v3365_v33  ;;  %1312 = vmatpush.msra.mxu1 %v3366_v37 }
 0x318   :  { %1332 = vmatpush.msra.mxu2 %v3367_v41  ;;  %1352 = vmatpush.msra.mxu3 %v3368_v15 }
 0x319   :  { %1293 = vmatpush.msrb.mxu0 %v3369_v47  ;;  %1313 = vmatpush.msra.mxu1 %v3370_v55 }
 0x31a   :  { %1333 = vmatpush.msra.mxu2 %v3371_v46  ;;  %1353 = vmatpush.msra.mxu3 %v3372_v30 }
 0x31b   :  { %1294 = vmatpush.msrb.mxu0 %v3373_v44  ;;  %1314 = vmatpush.msra.mxu1 %v3374_v43 }
 0x31c   :  { %1334 = vmatpush.msra.mxu2 %v3375_v34  ;;  %1354 = vmatpush.msra.mxu3 %v3376_v54  ;;  %v3389_v54 = vld [vmem:[#allocation47_spill] sm:$0xff] }
 0x31d   :  { %1295 = vmatpush.msrb.mxu0 %v3377_v52  ;;  %1315 = vmatpush.msra.mxu1 %v3378_v40  ;;  %v3388_v52 = vld [vmem:[#allocation34_spill] sm:$0xff]  ;;  %v3390_v34 = vld [vmem:[#allocation51_spill] sm:$0xff] }
 0x31e   :  { %1335 = vmatpush.msra.mxu2 %v3379_v38  ;;  %1355 = vmatpush.msra.mxu3 %v3380_v53 }
 0x31f   :  { %1296 = vmatpush.msrb.mxu0 %v3381_v56  ;;  %1316 = vmatpush.msra.mxu1 %v3382_v39 }
 0x320   :  { %1336 = vmatpush.msra.mxu2 %v3383_v51  ;;  %1356 = vmatpush.msra.mxu3 %v3384_v42  ;;  %v3391_v42 = vld [vmem:[#allocation53_spill] sm:$0xff] }
 0x321   :  { %1297 = vmatpush.msrb.mxu0 %v3385_v36  ;;  %1317 = vmatpush.msra.mxu1 %v3386_v50 }
 0x322   :  { %1337 = vmatpush.msra.mxu2 %v3387_v58  ;;  %1357 = vmatpush.msra.mxu3 %v3388_v52 }
 0x37e   :  { %v997_v40 = vpop.f32.mrf.mxu0  ;;  %v1017_v38 = vpop.f32.mrf.mxu1 }
 0x37f   :  { %v1060_v53 = vadd.f32 %v997_v40, %v3389_v54  ;;  %v1061_v56 = vadd.f32 %v1017_v38, %v3390_v34  ;;  %v3392_v34 = vld [vmem:[#allocation52_spill] sm:$0xff] }
 0x381   :  { %v1711_v43 = vmul.f32 -1.442695, %v1060_v53  ;;  %v1712_v39 = vmul.f32 -1.442695, %v1061_v56 }
 0x383   :  { %1805 = vpow2.f32 %v1711_v43 }
 0x384   :  { %1807 = vpow2.f32 %v1712_v39 }
 0x385   :  { %v1057_v51 = vpop.f32.mrf.mxu3  ;;  %v1037_v52 = vpop.f32.mrf.mxu2 }
 0x386   :  { %v1063_v44 = vadd.f32 %v1057_v51, %v3391_v42  ;;  %v1062_v38 = vadd.f32 %v1037_v52, %v3392_v34 }
 0x388   :  { %v1713_v36 = vmul.f32 -1.442695, %v1063_v44 }
 0x389   :  { %v1806_v30 = vpop.eup %1805 }
 0x38a   :  { %v1808_v50 = vpop.eup %1807  ;;  %v1067_v46 = vadd.f32 1.0, %v1806_v30  ;;  %1809 = vpow2.f32 %v1713_v36 }
 0x38b   :  { %v1086_v58 = vadd.f32 1.0, %v1808_v50 }
 0x38c   :  { %1811 = vrcp.f32 %v1067_v46  ;;  %v1079_v44 = vand.u32 2147483648, %v1067_v46  ;;  %v1077_v36 = vand.u32 2147483647, %v1067_v46  ;;  %vm1073_vm4 = vweird.f32 %v1067_v46 }
 0x38d   :  { %1813 = vrcp.f32 %v1086_v58  ;;  %v1098_v42 = vand.u32 2147483648, %v1086_v58  ;;  %v1096_v47 = vand.u32 2147483647, %v1086_v58  ;;  %vm1092_vm5 = vweird.f32 %v1086_v58 }
 0x38e   :  { %v1080_v52 = vor.u32 1.1754944e-38, %v1079_v44  ;;  %vm1078_vm8 = vcmp.eq.f32.partialorder %v1077_v36, 8.507059e+37 }
 0x38f   :  { %vm1097_vm9 = vcmp.eq.f32.partialorder %v1096_v47, 8.507059e+37 }
 0x390   :  { %v1810_v55 = vpop.eup %1809 }
 0x391   :  { %v1106_v54 = vadd.f32 1.0, %v1810_v55 }
 0x392   :  { %v1812_v40 = vpop.eup %1811 }
 0x393   :  { %v1814_v53 = vpop.eup %1813  ;;  %v1069_v43 = vmul.f32 %v1812_v40, %v1067_v46  ;;  %1815 = vrcp.f32 %v1106_v54  ;;  %vm1074_vm2 = vweird.f32 %v1812_v40  ;;  %v1118_v44 = vand.u32 2147483648, %v1106_v54 }
 0x394   :  { %v1088_v56 = vmul.f32 %v1814_v53, %v1086_v58  ;;  %1817 = vtanh.f32 %v1062_v38  ;;  %vm1093_vm3 = vweird.f32 %v1814_v53  ;;  %vm1075_vm6 = vmor %vm1073_vm4, %vm1074_vm2  ;;  %vm1112_vm11 = vweird.f32 %v1106_v54 }
 0x395   :  { %v1070_v39 = vsub.f32 1.0, %v1069_v43  ;;  %vm1094_vm7 = vmor %vm1092_vm5, %vm1093_vm3  ;;  %v1099_v43 = vor.u32 1.1754944e-38, %v1098_v42  ;;  %v1119_v36 = vor.u32 1.1754944e-38, %v1118_v44 }
 0x396   :  { %v1089_v51 = vsub.f32 1.0, %v1088_v56 }
 0x397   :  { %v1071_v30 = vmul.f32 %v1812_v40, %v1070_v39 }
 0x398   :  { %v1090_v50 = vmul.f32 %v1814_v53, %v1089_v51 }
 0x399   :  { %v1816_v15 = vpop.eup %1815  ;;  %v1072_v55 = vadd.f32 %v1812_v40, %v1071_v30 }
 0x39a   :  { %v1091_v34 = vadd.f32 %v1814_v53, %v1090_v50  ;;  %v1108_v41 = vmul.f32 %v1816_v15, %v1106_v54  ;;  %v1818_v38 = vpop.eup %1817  ;;  %vm1113_vm10 = vweird.f32 %v1816_v15 }
 0x39b   :  { %v1076_v56 = vsel %vm1075_vm6, %v1812_v40, %v1072_v55  ;;  %v1116_v40 = vand.u32 2147483647, %v1106_v54  ;;  %vm1114_vm12 = vmor %vm1112_vm11, %vm1113_vm10  ;;  %v3422_v55 = vld [vmem:[#allocation55_spill] sm:$0xff] }
 0x39c   :  { %v1081_v37 = vsel %vm1078_vm8, %v1080_v52, %v1076_v56  ;;  %v1095_v39 = vsel %vm1094_vm7, %v1814_v53, %v1091_v34  ;;  %v1109_v33 = vsub.f32 1.0, %v1108_v41 }
 0x39d   :  { %v1100_v51 = vsel %vm1097_vm9, %v1099_v43, %v1095_v39  ;;  %v1123_v45 = vmul.f32 %v1818_v38, %v1081_v37  ;;  %vm1117_vm13 = vcmp.eq.f32.partialorder %v1116_v40, 8.507059e+37 }
 0x39e   :  { %v1122_v26 = vmul.f32 %v1100_v51, %v2904_v49  ;;  %v1110_v30 = vmul.f32 %v1816_v15, %v1109_v33 }
 0x3a0   :  { %v2976_v46 = vadd.f32 %v1123_v45, %v1122_v26  ;;  %v1111_v58 = vadd.f32 %v1816_v15, %v1110_v30 }
 0x3a2   :  { %1819 = vtanh.f32 %v2976_v46  ;;  %v1115_v42 = vsel %vm1114_vm12, %v1816_v15, %v1111_v58 }
 0x3a3   :  { %v1120_v41 = vsel %vm1117_vm13, %v1119_v36, %v1115_v42 }
 0x3a8   :  { %v1820_v47 = vpop.eup %1819 }
 0x3a9   :  { %v1126_v53 = vmul.f32 %v1820_v47, %v1120_v41 }
 0x3ab   :  { %1147 = vmatmul.f32.vlgmr.msra.gmra.mxu0 %v1126_v53  ;;  %1167 = vmatmul.f32.vlgmr.msrb.gmra.mxu1 %v1126_v53 }
 0x3ac   :  { %1187 = vmatmul.f32.vlgmr.msrb.gmra.mxu2 %v1126_v53  ;;  %1207 = vmatmul.f32.vlgmr.msrb.gmra.mxu3 %v1126_v53 }
 0x3ad   :  { %1433 = vmatpush.msra.mxu0 %v2635_v1  ;;  %1453 = vmatpush.msrb.mxu1 %v2638_v59  ;;  %v3393_v1 = vld [vmem:[#allocation29_spill] sm:$0xff]  ;;  %v3394_v59 = vld [vmem:[#allocation19_spill] sm:$0xff] }
 0x3ae   :  { %1473 = vmatpush.msrb.mxu2 %v2641_v60  ;;  %1493 = vmatpush.msrb.mxu3 %v2644_v62  ;;  %v3395_v60 = vld [vmem:[#allocation14_spill] sm:$0xff] }
 0x3af   :  { %1434 = vmatpush.msra.mxu0 %v2647_v3  ;;  %1454 = vmatpush.msrb.mxu1 %v2650_v10  ;;  %v3396_v62 = vld [vmem:[#allocation10_spill] sm:$0xff]  ;;  %v3397_v3 = vld [vmem:[#allocation25_spill] sm:$0xff] }
 0x3b0   :  { %1474 = vmatpush.msrb.mxu2 %v2653_v5  ;;  %1494 = vmatpush.msrb.mxu3 %v2656_v22  ;;  %v3398_v10 = vld [vmem:[#allocation13_spill] sm:$0xff]  ;;  %v3399_v5 = vld [vmem:[#allocation23_spill] sm:$0xff] }
 0x3b1   :  { %1435 = vmatpush.msra.mxu0 %v2659_v48  ;;  %1455 = vmatpush.msrb.mxu1 %v2662_v13  ;;  %v3400_v22 = vld [vmem:[#allocation17_spill] sm:$0xff]  ;;  %v3401_v48 = vld [vmem:[#allocation15_spill] sm:$0xff] }
 0x3b2   :  { %1475 = vmatpush.msrb.mxu2 %v2665_v8  ;;  %1495 = vmatpush.msrb.mxu3 %v2668_v7  ;;  %v3402_v13 = vld [vmem:[#allocation11_spill] sm:$0xff]  ;;  %v3403_v8 = vld [vmem:[#allocation16_spill] sm:$0xff]  ;;  %v3404_v7 = vld [vmem:[#allocation26_spill] sm:$0xff] }
 0x3b3   :  { %1436 = vmatpush.msra.mxu0 %v2671_v12  ;;  %1456 = vmatpush.msrb.mxu1 %v2674_v20  ;;  %v3405_v12 = vld [vmem:[#allocation24_spill] sm:$0xff] }
 0x3b4   :  { %1476 = vmatpush.msrb.mxu2 %v2677_v35  ;;  %1496 = vmatpush.msrb.mxu3 %v2680_v14  ;;  %v3406_v20 = vld [vmem:[#allocation32_spill] sm:$0xff]  ;;  %v3407_v35 = vld [vmem:[#allocation21_spill] sm:$0xff] }
 0x3b5   :  { %1437 = vmatpush.msra.mxu0 %v2683_v18  ;;  %1457 = vmatpush.msrb.mxu1 %v2686_v57  ;;  %v3408_v14 = vld [vmem:[#allocation28_spill] sm:$0xff]  ;;  %v3409_v18 = vld [vmem:[#allocation18_spill] sm:$0xff]  ;;  %v3410_v57 = vld [vmem:[#allocation27_spill] sm:$0xff] }
 0x3b6   :  { %1477 = vmatpush.msrb.mxu2 %v2689_v0  ;;  %1497 = vmatpush.msrb.mxu3 %v2692_v9  ;;  %v3411_v0 = vld [vmem:[#allocation12_spill] sm:$0xff]  ;;  %v3412_v9 = vld [vmem:[#allocation33_spill] sm:$0xff] }
 0x3b7   :  { %1438 = vmatpush.msra.mxu0 %v2695_v63  ;;  %1458 = vmatpush.msrb.mxu1 %v2698_v21  ;;  %v3413_v63 = vld [vmem:[#allocation31_spill] sm:$0xff]  ;;  %v3414_v21 = vld [vmem:[#allocation22_spill] sm:$0xff] }
 0x3b8   :  { %1478 = vmatpush.msrb.mxu2 %v2701_v17  ;;  %1498 = vmatpush.msrb.mxu3 %v2704_v23  ;;  %v3415_v17 = vld [vmem:[#allocation20_spill] sm:$0xff]  ;;  %v3416_v23 = vld [vmem:[#allocation30_spill] sm:$0xff] }
 0x3b9   :  { %1439 = vmatpush.msra.mxu0 %v2707_v11  ;;  %1459 = vmatpush.msrb.mxu1 %v2710_v61  ;;  %v3417_v11 = vld [vmem:[#allocation35_spill] sm:$0xff]  ;;  %v3418_v61 = vld [vmem:[#allocation34_spill] sm:$0xff] }
 0x3ba   :  { %1479 = vmatpush.msrb.mxu2 %v2713_v6  ;;  %1499 = vmatpush.msrb.mxu3 %v2716_v4 }
 0x3bb   :  { %1440 = vmatpush.msra.mxu0 %v2719_v2  ;;  %1460 = vmatpush.msrb.mxu1 %v2722_v16  ;;  %v3419_v2 = vld [vmem:[#allocation9_spill] sm:$0xff] }
 0x3bc   :  { %1480 = vmatpush.msrb.mxu2 %v2725_v19  ;;  %1500 = vmatpush.msrb.mxu3 %v2728_v24  ;;  %v3420_v19 = vld [vmem:[#allocation54_spill] sm:$0xff] }
 0x3bd   :  { %1441 = vmatpush.msra.mxu0 %v2731_v25  ;;  %1461 = vmatpush.msrb.mxu1 %v2734_v27 }
 0x3be   :  { %1481 = vmatpush.msrb.mxu2 %v2737_v28  ;;  %1501 = vmatpush.msrb.mxu3 %v2740_v29  ;;  %v3421_v29 = vld [vmem:[#allocation56_spill] sm:$0xff] }
 0x3bf   :  { %1442 = vmatpush.msra.mxu0 %v2743_v31  ;;  %1462 = vmatpush.msrb.mxu1 %v2746_v32 }
 0x3c0   :  { %1482 = vmatpush.msrb.mxu2 %v3393_v1  ;;  %1502 = vmatpush.msrb.mxu3 %v3394_v59 }
 0x3c1   :  { %1443 = vmatpush.msra.mxu0 %v3395_v60  ;;  %1463 = vmatpush.msrb.mxu1 %v3396_v62 }
 0x3c2   :  { %1483 = vmatpush.msrb.mxu2 %v3397_v3  ;;  %1503 = vmatpush.msrb.mxu3 %v3398_v10 }
 0x3c3   :  { %1444 = vmatpush.msra.mxu0 %v3399_v5  ;;  %1464 = vmatpush.msrb.mxu1 %v3400_v22 }
 0x3c4   :  { %1484 = vmatpush.msrb.mxu2 %v3401_v48  ;;  %1504 = vmatpush.msrb.mxu3 %v3402_v13 }
 0x3c5   :  { %1445 = vmatpush.msra.mxu0 %v3403_v8  ;;  %1465 = vmatpush.msrb.mxu1 %v3404_v7 }
 0x3c6   :  { %1485 = vmatpush.msrb.mxu2 %v3405_v12  ;;  %1505 = vmatpush.msrb.mxu3 %v3406_v20 }
 0x3c7   :  { %1446 = vmatpush.msra.mxu0 %v3407_v35  ;;  %1466 = vmatpush.msrb.mxu1 %v3408_v14 }
 0x3c8   :  { %1486 = vmatpush.msrb.mxu2 %v3409_v18  ;;  %1506 = vmatpush.msrb.mxu3 %v3410_v57 }
 0x3c9   :  { %1447 = vmatpush.msra.mxu0 %v3411_v0  ;;  %1467 = vmatpush.msrb.mxu1 %v3412_v9 }
 0x3ca   :  { %1487 = vmatpush.msrb.mxu2 %v3413_v63  ;;  %1507 = vmatpush.msrb.mxu3 %v3414_v21  ;;  %v3423_v21 = vld [vmem:[#allocation36_spill] sm:$0xff] }
 0x3cb   :  { %1448 = vmatpush.msra.mxu0 %v3415_v17  ;;  %1468 = vmatpush.msrb.mxu1 %v3416_v23  ;;  %v3424_v23 = vld [vmem:[#allocation57_spill] sm:$0xff] }
 0x3cc   :  { %1488 = vmatpush.msrb.mxu2 %v3417_v11  ;;  %1508 = vmatpush.msrb.mxu3 %v3418_v61 }
 0x428   :  { %v1148_v6 = vpop.f32.mrf.mxu0  ;;  %v1168_v4 = vpop.f32.mrf.mxu1 }
 0x429   :  { %v1211_v16 = vadd.f32 %v1148_v6, %v3419_v2  ;;  %v1212_v24 = vadd.f32 %v1168_v4, %v3420_v19  ;;  %v3425_v2 = vld [vmem:[#allocation59_spill] sm:$0xff] }
 0x42b   :  { %v1714_v25 = vmul.f32 -1.442695, %v1211_v16  ;;  %v1715_v27 = vmul.f32 -1.442695, %v1212_v24 }
 0x42d   :  { %1821 = vpow2.f32 %v1714_v25 }
 0x42e   :  { %1823 = vpow2.f32 %v1715_v27 }
 0x42f   :  { %v1208_v28 = vpop.f32.mrf.mxu3  ;;  %v1188_v37 = vpop.f32.mrf.mxu2 }
 0x430   :  { %v1214_v31 = vadd.f32 %v1208_v28, %v3421_v29  ;;  %v1213_v52 = vadd.f32 %v1188_v37, %v3422_v55 }
 0x432   :  { %v1716_v32 = vmul.f32 -1.442695, %v1214_v31 }
 0x433   :  { %v1822_v49 = vpop.eup %1821 }
 0x434   :  { %v1824_v26 = vpop.eup %1823  ;;  %v1218_v45 = vadd.f32 1.0, %v1822_v49  ;;  %1825 = vpow2.f32 %v1716_v32 }
 0x435   :  { %v1237_v33 = vadd.f32 1.0, %v1824_v26  ;;  %v3426_v26 = vld [vmem:[#allocation58_spill] sm:$0xff] }
 0x436   :  { %1827 = vrcp.f32 %v1218_v45  ;;  %v1230_v51 = vand.u32 2147483648, %v1218_v45  ;;  %v1228_v44 = vand.u32 2147483647, %v1218_v45  ;;  %vm1224_vm0 = vweird.f32 %v1218_v45 }
 0x437   :  { %1829 = vrcp.f32 %v1237_v33  ;;  %v1249_v30 = vand.u32 2147483648, %v1237_v33  ;;  %v1247_v42 = vand.u32 2147483647, %v1237_v33  ;;  %vm1243_vm1 = vweird.f32 %v1237_v33 }
 0x438   :  { %v1231_v41 = vor.u32 1.1754944e-38, %v1230_v51  ;;  %vm1229_vm4 = vcmp.eq.f32.partialorder %v1228_v44, 8.507059e+37 }
 0x439   :  { %v1250_v59 = vor.u32 1.1754944e-38, %v1249_v30  ;;  %vm1248_vm5 = vcmp.eq.f32.partialorder %v1247_v42, 8.507059e+37 }
 0x43a   :  { %v1826_v15 = vpop.eup %1825 }
 0x43b   :  { %v1257_v54 = vadd.f32 1.0, %v1826_v15 }
 0x43c   :  { %v1828_v50 = vpop.eup %1827 }
 0x43d   :  { %v1830_v34 = vpop.eup %1829  ;;  %v1220_v43 = vmul.f32 %v1828_v50, %v1218_v45  ;;  %1831 = vrcp.f32 %v1257_v54  ;;  %vm1225_vm14 = vweird.f32 %v1828_v50  ;;  %v1269_v20 = vand.u32 2147483648, %v1257_v54 }
 0x43e   :  { %v1239_v56 = vmul.f32 %v1830_v34, %v1237_v33  ;;  %1833 = vtanh.f32 %v1213_v52  ;;  %vm1244_vm15 = vweird.f32 %v1830_v34  ;;  %vm1226_vm2 = vmor %vm1224_vm0, %vm1225_vm14  ;;  %vm1263_vm7 = vweird.f32 %v1257_v54 }
 0x43f   :  { %v1221_v38 = vsub.f32 1.0, %v1220_v43  ;;  %vm1245_vm3 = vmor %vm1243_vm1, %vm1244_vm15  ;;  %v1267_v35 = vand.u32 2147483647, %v1257_v54  ;;  %v1270_v18 = vor.u32 1.1754944e-38, %v1269_v20 }
 0x440   :  { %v1240_v39 = vsub.f32 1.0, %v1239_v56 }
 0x441   :  { %v1222_v58 = vmul.f32 %v1828_v50, %v1221_v38  ;;  %vm1268_vm9 = vcmp.eq.f32.partialorder %v1267_v35, 8.507059e+37  ;;  %v1594_v35 = vld [vmem:[%s3125_s4 + $0x70] sm:$0xff] }
 0x442   :  { %v1241_v40 = vmul.f32 %v1830_v34, %v1240_v39 }
 0x443   :  { %v1832_v36 = vpop.eup %1831  ;;  %v1223_v47 = vadd.f32 %v1828_v50, %v1222_v58 }
 0x444   :  { %v1242_v53 = vadd.f32 %v1830_v34, %v1241_v40  ;;  %v1259_v1 = vmul.f32 %v1832_v36, %v1257_v54  ;;  %v1834_v62 = vpop.eup %1833  ;;  %vm1264_vm6 = vweird.f32 %v1832_v36 }
 0x445   :  { %v1227_v60 = vsel %vm1226_vm2, %v1828_v50, %v1223_v47  ;;  %vm1265_vm8 = vmor %vm1263_vm7, %vm1264_vm6 }
 0x446   :  { %v1232_v3 = vsel %vm1229_vm4, %v1231_v41, %v1227_v60  ;;  %v1246_v10 = vsel %vm1245_vm3, %v1830_v34, %v1242_v53  ;;  %v1260_v5 = vsub.f32 1.0, %v1259_v1 }
 0x447   :  { %v1251_v22 = vsel %vm1248_vm5, %v1250_v59, %v1246_v10  ;;  %v1274_v48 = vmul.f32 %v1834_v62, %v1232_v3 }
 0x448   :  { %v1273_v13 = vmul.f32 %v1251_v22, %v2976_v46  ;;  %v1261_v8 = vmul.f32 %v1832_v36, %v1260_v5 }
 0x44a   :  { %v3048_v7 = vadd.f32 %v1274_v48, %v1273_v13  ;;  %v1262_v12 = vadd.f32 %v1832_v36, %v1261_v8 }
 0x44c   :  { %1835 = vtanh.f32 %v3048_v7  ;;  %v1266_v14 = vsel %vm1265_vm8, %v1832_v36, %v1262_v12 }
 0x44d   :  { %v1271_v0 = vsel %vm1268_vm9, %v1270_v18, %v1266_v14  ;;  %v1593_v14 = vld [vmem:[%s3125_s4 + $0x68] sm:$0xff]  ;;  %v1592_v18 = vld [vmem:[%s3125_s4 + $0x60] sm:$0xff] }
 0x452   :  { %v1836_v57 = vpop.eup %1835 }
 0x453   :  { %v1277_v9 = vmul.f32 %v1836_v57, %v1271_v0  ;;  %v1591_v57 = vld [vmem:[%s3125_s4 + $0x58] sm:$0xff]  ;;  %v1590_v0 = vld [vmem:[%s3125_s4 + $0x50] sm:$0xff] }
 0x455   :  { %1298 = vmatmul.f32.vlgmr.msrb.gmra.mxu0 %v1277_v9  ;;  %1318 = vmatmul.f32.vlgmr.msra.gmra.mxu1 %v1277_v9 }
 0x456   :  { %1338 = vmatmul.f32.vlgmr.msra.gmra.mxu2 %v1277_v9  ;;  %1358 = vmatmul.f32.vlgmr.msra.gmra.mxu3 %v1277_v9  ;;  %v1589_v9 = vld [vmem:[%s3125_s4 + $0x48] sm:$0xff] }
 0x4d2   :  { %v1299_v46 = vpop.f32.mrf.mxu0  ;;  %v1319_v63 = vpop.f32.mrf.mxu1 }
 0x4d3   :  { %v1362_v17 = vadd.f32 %v1299_v46, %v3423_v21  ;;  %v1363_v11 = vadd.f32 %v1319_v63, %v3424_v23  ;;  %v1588_v46 = vld [vmem:[%s3125_s4 + $0x40] sm:$0xff]  ;;  %v1587_v63 = vld [vmem:[%s3125_s4 + $0x38] sm:$0xff]  ;;  %v1586_v21 = vld [vmem:[%s3125_s4 + $0x30] sm:$0xff] }
 0x4d5   :  { %v1717_v61 = vmul.f32 -1.442695, %v1362_v17  ;;  %v1718_v6 = vmul.f32 -1.442695, %v1363_v11  ;;  %v3427_v11 = vld [vmem:[#allocation37_spill] sm:$0xff] }
 0x4d7   :  { %1837 = vpow2.f32 %v1717_v61 }
 0x4d8   :  { %1839 = vpow2.f32 %v1718_v6  ;;  %v3428_v6 = vld [vmem:[#allocation60_spill] sm:$0xff] }
 0x4d9   :  { %v1359_v4 = vpop.f32.mrf.mxu3  ;;  %v1339_v29 = vpop.f32.mrf.mxu2 }
 0x4da   :  { %v1365_v16 = vadd.f32 %v1359_v4, %v3425_v2  ;;  %v1364_v45 = vadd.f32 %v1339_v29, %v3426_v26  ;;  %v1585_v2 = vld [vmem:[%s3125_s4 + $0x28] sm:$0xff] }
 0x4db   :  { %v1581_v29 = vld [vmem:[%s3125_s4 + $0x8] sm:$0xff] }
 0x4dc   :  { %v1719_v19 = vmul.f32 -1.442695, %v1365_v16 }
 0x4dd   :  { %v1838_v24 = vpop.eup %1837 }
 0x4de   :  { %v1840_v25 = vpop.eup %1839  ;;  %v1369_v27 = vadd.f32 1.0, %v1838_v24  ;;  %1841 = vpow2.f32 %v1719_v19  ;;  %v1584_v24 = vld [vmem:[%s3125_s4 + $0x20] sm:$0xff] }
 0x4df   :  { %v1388_v28 = vadd.f32 1.0, %v1840_v25  ;;  %v1583_v25 = vld [vmem:[%s3125_s4 + $0x18] sm:$0xff] }
 0x4e0   :  { %1843 = vrcp.f32 %v1369_v27  ;;  %v1381_v55 = vand.u32 2147483648, %v1369_v27  ;;  %v1379_v43 = vand.u32 2147483647, %v1369_v27  ;;  %vm1375_vm12 = vweird.f32 %v1369_v27 }
 0x4e1   :  { %1845 = vrcp.f32 %v1388_v28  ;;  %v1400_v52 = vand.u32 2147483648, %v1388_v28  ;;  %v1398_v38 = vand.u32 2147483647, %v1388_v28  ;;  %vm1394_vm13 = vweird.f32 %v1388_v28 }
 0x4e2   :  { %v1382_v30 = vor.u32 1.1754944e-38, %v1381_v55  ;;  %vm1380_vm0 = vcmp.eq.f32.partialorder %v1379_v43, 8.507059e+37 }
 0x4e3   :  { %v1401_v40 = vor.u32 1.1754944e-38, %v1400_v52  ;;  %vm1399_vm1 = vcmp.eq.f32.partialorder %v1398_v38, 8.507059e+37 }
 0x4e4   :  { %v1842_v31 = vpop.eup %1841 }
 0x4e5   :  { %v1408_v32 = vadd.f32 1.0, %v1842_v31  ;;  %v3429_v31 = vld [vmem:[#allocation62_spill] sm:$0xff] }
 0x4e6   :  { %v1844_v49 = vpop.eup %1843 }
 0x4e7   :  { %v1846_v33 = vpop.eup %1845  ;;  %v1371_v37 = vmul.f32 %v1844_v49, %v1369_v27  ;;  %1847 = vrcp.f32 %v1408_v32  ;;  %vm1376_vm10 = vweird.f32 %v1844_v49  ;;  %v1420_v5 = vand.u32 2147483648, %v1408_v32  ;;  %v1582_v27 = vld [vmem:[%s3125_s4 + $0x10] sm:$0xff] }
 0x4e8   :  { %v1390_v15 = vmul.f32 %v1846_v33, %v1388_v28  ;;  %1849 = vtanh.f32 %v1364_v45  ;;  %vm1395_vm11 = vweird.f32 %v1846_v33  ;;  %vm1377_vm14 = vmor %vm1375_vm12, %vm1376_vm10  ;;  %vm1414_vm3 = vweird.f32 %v1408_v32 }
 0x4e9   :  { %v1372_v54 = vsub.f32 1.0, %v1371_v37  ;;  %vm1396_vm15 = vmor %vm1394_vm13, %vm1395_vm11  ;;  %v1418_v22 = vand.u32 2147483647, %v1408_v32  ;;  %v1421_v13 = vor.u32 1.1754944e-38, %v1420_v5 }
 0x4ea   :  { %v1391_v50 = vsub.f32 1.0, %v1390_v15 }
 0x4eb   :  { %v1373_v34 = vmul.f32 %v1844_v49, %v1372_v54  ;;  %vm1419_vm5 = vcmp.eq.f32.partialorder %v1418_v22, 8.507059e+37 }
 0x4ec   :  { %v1392_v56 = vmul.f32 %v1846_v33, %v1391_v50 }
 0x4ed   :  { %v1848_v39 = vpop.eup %1847  ;;  %v1374_v51 = vadd.f32 %v1844_v49, %v1373_v34  ;;  %v3430_v34 = vld [vmem:[#allocation61_spill] sm:$0xff] }
 0x4ee   :  { %v1393_v58 = vadd.f32 %v1846_v33, %v1392_v56  ;;  %v1410_v44 = vmul.f32 %v1848_v39, %v1408_v32  ;;  %v1850_v36 = vpop.eup %1849  ;;  %vm1415_vm2 = vweird.f32 %v1848_v39 }
 0x4ef   :  { %v1378_v42 = vsel %vm1377_vm14, %v1844_v49, %v1374_v51  ;;  %vm1416_vm4 = vmor %vm1414_vm3, %vm1415_vm2  ;;  %v1580_v49 = vld [vmem:[%s3125_s4] sm:$0xff]  ;;  %vm1620_vm2 = vcmask 80896  }
 0x4f0   :  { %v1383_v47 = vsel %vm1380_vm0, %v1382_v30, %v1378_v42  ;;  %v1397_v41 = vsel %vm1396_vm15, %v1846_v33, %v1393_v58  ;;  %v1411_v53 = vsub.f32 1.0, %v1410_v44 }
 0x4f1   :  { %v1402_v1 = vsel %vm1399_vm1, %v1401_v40, %v1397_v41  ;;  %v1425_v59 = vmul.f32 %v1850_v36, %v1383_v47 }
 0x4f2   :  { %v1424_v60 = vmul.f32 %v1402_v1, %v3048_v7  ;;  %v1412_v62 = vmul.f32 %v1848_v39, %v1411_v53  ;;  %v1595_v7 = vld [vmem:[%s3125_s4 + $0x78] sm:$0xff] }
 0x4f3   :  { %1600 = vmatpush.msrb.mxu0 %v1595_v7 }
 0x4f4   :  { %v3056_v3 = vadd.f32 %v1425_v59, %v1424_v60  ;;  %v1413_v10 = vadd.f32 %v1848_v39, %v1412_v62 }
 0x4f5   :  { %1601 = vmatpush.msrb.mxu0 %v1594_v35 }
 0x4f6   :  { %1851 = vtanh.f32 %v3056_v3  ;;  %v1417_v48 = vsel %vm1416_vm4, %v1848_v39, %v1413_v10 }
 0x4f7   :  { %v1422_v12 = vsel %vm1419_vm5, %v1421_v13, %v1417_v48  ;;  %1602 = vmatpush.msrb.mxu0 %v1593_v14 }
 0x4f9   :  { %1603 = vmatpush.msrb.mxu0 %v1592_v18 }
 0x4fb   :  { %1604 = vmatpush.msrb.mxu0 %v1591_v57 }
 0x4fc   :  { %v1852_v8 = vpop.eup %1851 }
 0x4fd   :  { %v1428_v20 = vmul.f32 %v1852_v8, %v1422_v12  ;;  %1605 = vmatpush.msrb.mxu0 %v1590_v0 }
 0x4ff   :  { %1449 = vmatmul.f32.vlgmr.msra.gmra.mxu0 %v1428_v20  ;;  %1469 = vmatmul.f32.vlgmr.msrb.gmra.mxu1 %v1428_v20 }
 0x500   :  { %1489 = vmatmul.f32.vlgmr.msrb.gmra.mxu2 %v1428_v20  ;;  %1509 = vmatmul.f32.vlgmr.msrb.gmra.mxu3 %v1428_v20 }
 0x501   :  { %1606 = vmatpush.msrb.mxu0 %v1589_v9 }
 0x503   :  { %1607 = vmatpush.msrb.mxu0 %v1588_v46 }
 0x505   :  { %1608 = vmatpush.msrb.mxu0 %v1587_v63 }
 0x507   :  { %1609 = vmatpush.msrb.mxu0 %v1586_v21 }
 0x509   :  { %1610 = vmatpush.msrb.mxu0 %v1585_v2 }
 0x50b   :  { %1611 = vmatpush.msrb.mxu0 %v1584_v24 }
 0x50d   :  { %1612 = vmatpush.msrb.mxu0 %v1583_v25 }
 0x50f   :  { %1613 = vmatpush.msrb.mxu0 %v1582_v27 }
 0x511   :  { %1614 = vmatpush.msrb.mxu0 %v1581_v29 }
 0x513   :  { %1615 = vmatpush.msrb.mxu0 %v1580_v49 }
 0x57c   :  { %v1450_v17 = vpop.f32.mrf.mxu0  ;;  %v1470_v23 = vpop.f32.mrf.mxu1 }
 0x57d   :  { %v1513_v61 = vadd.f32 %v1450_v17, %v3427_v11  ;;  %v1514_v4 = vadd.f32 %v1470_v23, %v3428_v6 }
 0x57f   :  { %v1720_v16 = vmul.f32 -1.442695, %v1513_v61  ;;  %v1721_v19 = vmul.f32 -1.442695, %v1514_v4 }
 0x581   :  { %1853 = vpow2.f32 %v1720_v16 }
 0x582   :  { %1855 = vpow2.f32 %v1721_v19 }
 0x583   :  { %v1510_v28 = vpop.f32.mrf.mxu3  ;;  %v1490_v54 = vpop.f32.mrf.mxu2 }
 0x584   :  { %v1516_v32 = vadd.f32 %v1510_v28, %v3429_v31  ;;  %v1515_v43 = vadd.f32 %v1490_v54, %v3430_v34 }
 0x586   :  { %v1722_v26 = vmul.f32 -1.442695, %v1516_v32 }
 0x587   :  { %v1854_v45 = vpop.eup %1853 }
 0x588   :  { %v1856_v33 = vpop.eup %1855  ;;  %v1520_v37 = vadd.f32 1.0, %v1854_v45  ;;  %1857 = vpow2.f32 %v1722_v26 }
 0x589   :  { %v1539_v15 = vadd.f32 1.0, %v1856_v33 }
 0x58a   :  { %1859 = vrcp.f32 %v1520_v37  ;;  %v1532_v58 = vand.u32 2147483648, %v1520_v37  ;;  %v1530_v42 = vand.u32 2147483647, %v1520_v37  ;;  %vm1526_vm8 = vweird.f32 %v1520_v37 }
 0x58b   :  { %1861 = vrcp.f32 %v1539_v15  ;;  %v1551_v44 = vand.u32 2147483648, %v1539_v15  ;;  %v1549_v47 = vand.u32 2147483647, %v1539_v15  ;;  %vm1545_vm9 = vweird.f32 %v1539_v15 }
 0x58c   :  { %v1533_v1 = vor.u32 1.1754944e-38, %v1532_v58  ;;  %vm1531_vm12 = vcmp.eq.f32.partialorder %v1530_v42, 8.507059e+37 }
 0x58d   :  { %v1552_v62 = vor.u32 1.1754944e-38, %v1551_v44  ;;  %vm1550_vm13 = vcmp.eq.f32.partialorder %v1549_v47, 8.507059e+37 }
 0x58e   :  { %v1858_v50 = vpop.eup %1857 }
 0x58f   :  { %v1559_v55 = vadd.f32 1.0, %v1858_v50 }
 0x590   :  { %v1860_v52 = vpop.eup %1859 }
 0x591   :  { %v1862_v56 = vpop.eup %1861  ;;  %v1522_v38 = vmul.f32 %v1860_v52, %v1520_v37  ;;  %1863 = vrcp.f32 %v1559_v55  ;;  %vm1527_vm6 = vweird.f32 %v1860_v52  ;;  %v1571_v18 = vand.u32 2147483648, %v1559_v55 }
 0x592   :  { %v1541_v39 = vmul.f32 %v1862_v56, %v1539_v15  ;;  %1865 = vtanh.f32 %v1515_v43  ;;  %vm1546_vm7 = vweird.f32 %v1862_v56  ;;  %vm1528_vm10 = vmor %vm1526_vm8, %vm1527_vm6  ;;  %vm1565_vm15 = vweird.f32 %v1559_v55 }
 0x593   :  { %v1523_v51 = vsub.f32 1.0, %v1522_v38  ;;  %vm1547_vm11 = vmor %vm1545_vm9, %vm1546_vm7  ;;  %v1569_v57 = vand.u32 2147483647, %v1559_v55  ;;  %v1572_v9 = vor.u32 1.1754944e-38, %v1571_v18 }
 0x594   :  { %v1542_v30 = vsub.f32 1.0, %v1541_v39 }
 0x595   :  { %v1524_v40 = vmul.f32 %v1860_v52, %v1523_v51  ;;  %vm1570_vm1 = vcmp.eq.f32.partialorder %v1569_v57, 8.507059e+37 }
 0x596   :  { %v1543_v36 = vmul.f32 %v1862_v56, %v1542_v30 }
 0x597   :  { %v1864_v41 = vpop.eup %1863  ;;  %v1525_v53 = vadd.f32 %v1860_v52, %v1524_v40 }
 0x598   :  { %v1544_v59 = vadd.f32 %v1862_v56, %v1543_v36  ;;  %v1561_v60 = vmul.f32 %v1864_v41, %v1559_v55  ;;  %v1866_v5 = vpop.eup %1865  ;;  %vm1566_vm14 = vweird.f32 %v1864_v41 }
 0x599   :  { %v1529_v10 = vsel %vm1528_vm10, %v1860_v52, %v1525_v53  ;;  %vm1567_vm0 = vmor %vm1565_vm15, %vm1566_vm14 }
 0x59a   :  { %v1534_v22 = vsel %vm1531_vm12, %v1533_v1, %v1529_v10  ;;  %v1548_v48 = vsel %vm1547_vm11, %v1862_v56, %v1544_v59  ;;  %v1562_v13 = vsub.f32 1.0, %v1561_v60 }
 0x59b   :  { %v1553_v8 = vsel %vm1550_vm13, %v1552_v62, %v1548_v48  ;;  %v1576_v12 = vmul.f32 %v1866_v5, %v1534_v22 }
 0x59c   :  { %v1575_v20 = vmul.f32 %v1553_v8, %v3056_v3  ;;  %v1563_v7 = vmul.f32 %v1864_v41, %v1562_v13  ;;  %v1740_v3 = vld [vmem:[%s3126_s5] ss:$0 sm:$0xff]  ;;  %s1993_s5 = smov [#allocation6]  }
 0x59d   :  { %s1651_s30 = sshll.u32 %s1993_s5, 4  ;;  %s1652_s30 = int_to_ptr.vmem [resolvable:$true] %s1651_s30 }
 0x59e   :  { %v1577_v35 = vadd.f32 %v1576_v12, %v1575_v20  ;;  %v1564_v14 = vadd.f32 %v1864_v41, %v1563_v7 }
 0x5a0   :  { %1867 = vtanh.f32 %v1577_v35  ;;  %v1568_v0 = vsel %vm1567_vm0, %v1864_v41, %v1564_v14 }
 0x5a1   :  { %v1573_v63 = vsel %vm1570_vm1, %v1572_v9, %v1568_v0 }
 0x5a6   :  { %v1868_v46 = vpop.eup %1867 }
 0x5a7   :  { %v1579_v21 = vmul.f32 %v1868_v46, %v1573_v63 }
 0x5a9   :  { %1616 = vmatmul.f32.vlgmr.msrb.gmra.mxu0 %v1579_v21 }
 0x626   :  { %v1617_v17 = vpop.f32.mrf.mxu0 }
 0x627   :  { %v1618_v23 = vadd.f32 %v1740_v3, %v1617_v17 }
 0x629   :  { %v1621_v11 = vsel %vm1620_vm2, %v1618_v23, -inf }
 0x62a   :  { %1622 = vmax.xlane.f32.xlu0 %v1621_v11 }
 0x69d   :  { %v1623_v61 = vpop.xlane.xlu0 %1622 }
 0x69e   :  { %v1624_v6 = vsub.f32 %v1618_v23, %v1623_v61 }
 0x6a0   :  { %v1625_v4 = vmul.f32 1.442695, %v1624_v6 }
 0x6a2   :  { %1869 = vpow2.f32 %v1625_v4 }
 0x6a8   :  { %v1870_v2 = vpop.eup %1869 }
 0x6a9   :  { %v1627_v16 = vsel %vm1620_vm2, %v1870_v2, 0.0 }
 0x6aa   :  { %1628 = vadd.xlane.f32.xlu0 %v1627_v16 }
 0x71d   :  { %v1629_v19 = vpop.xlane.xlu0 %1628 }
 0x71e   :  { %1871 = vrcp.f32 %v1629_v19  ;;  %v1641_v28 = vand.u32 2147483648, %v1629_v19  ;;  %v1639_v31 = vand.u32 2147483647, %v1629_v19  ;;  %vm1635_vm4 = vweird.f32 %v1629_v19 }
 0x720   :  { %v1642_v49 = vor.u32 1.1754944e-38, %v1641_v28  ;;  %vm1640_vm6 = vcmp.eq.f32.partialorder %v1639_v31, 8.507059e+37 }
 0x724   :  { %v1872_v24 = vpop.eup %1871 }
 0x725   :  { %v1631_v25 = vmul.f32 %v1872_v24, %v1629_v19  ;;  %vm1636_vm3 = vweird.f32 %v1872_v24 }
 0x726   :  { %vm1637_vm5 = vmor %vm1635_vm4, %vm1636_vm3 }
 0x727   :  { %v1632_v27 = vsub.f32 1.0, %v1631_v25 }
 0x729   :  { %v1633_v29 = vmul.f32 %v1872_v24, %v1632_v27 }
 0x72b   :  { %v1634_v32 = vadd.f32 %v1872_v24, %v1633_v29 }
 0x72d   :  { %v1638_v26 = vsel %vm1637_vm5, %v1872_v24, %v1634_v32 }
 0x72e   :  { %v1643_v45 = vsel %vm1640_vm6, %v1642_v49, %v1638_v26 }
 0x72f   :  { %v1644_v33 = vmul.f32 %v1870_v2, %v1643_v45 }
 0x731   :  { %1645 = vst.msk [vmem:[#allocation6] sm:$0xff] %vm1620_vm2, %v1644_v33 }
 0x732   :  { %1656 = dma.vmem_to_hbm [thread:$0]  %s1652_s30, 128, %s1654_s8, [#allocation5]  }
 0x733   :  { %1987 = dma.done.wait [#allocation5], 128  }
 0x734   :  { %1988 = vsyncadd [#allocation5], 4294967168 }
 0x735   :  { %1661 = vsyncpa [#allocation4], 1 }
 0x736   :  { %1662 = vsyncpa [#allocation5], 1 }

</bundles_post_ra>
